<compile_context>
chip_gen: v7x
topology: tpu7x:2x2x1
jax: 0.10.0
libtpu: 0.0.40
codegen_flags: <defaults>
</compile_context>

<pallas_src>
import math
from functools import partial

import numpy as np
import jax
import jax.numpy as jnp
from jax.experimental import pallas as pl
from jax.experimental.pallas import tpu as pltpu


def _attention_kernel(x_ref, w_ref, cos_ref, sina_ref, sinb_ref, bias_ref,
                      o_ref, *, num_heads, head_dim):
    H, dh = num_heads, head_dim
    D = H * dh
    BT = x_ref.shape[0]            # batch folded into the row (M) dimension

    # Fused QKV projection: one (B*T, D) x (D, 3D) MXU matmul with bf16
    # operands and f32 accumulation.  Weight columns are head-major
    # [Q h0..h(H-1) | K ... | V ...], dh columns per head.
    qkv = jnp.dot(x_ref[...], w_ref[...],
                  preferred_element_type=jnp.float32)            # (BT, 3D) f32

    # GPT-J interleaved rotary on the [q | k] slab (first 2*D lanes, 128-wide
    # and lane-dense here).  rotate_every_two's sign and even/odd select are
    # folded into the sin_a / sin_b tables (and 1/sqrt(dh) into the q half),
    # so the roll wrap-around lanes are never selected (head_dim and
    # rotary_dim must be even).
    # TODO(synk): switch jnp.roll -> pltpu.roll (guaranteed XLU lane rotate)
    # once the hardware rotate direction is validated for this layout.
    qk = qkv[:, :2 * D]
    nxt = jnp.roll(qk, -1, axis=1)          # nxt[:, c] = qk[:, c + 1]
    prv = jnp.roll(qk, 1, axis=1)           # prv[:, c] = qk[:, c - 1]
    qk = qk * cos_ref[...] + nxt * sina_ref[...] + prv * sinb_ref[...]

    # Relayout into the head-batched (H, BT, dh) layout consumed by the two
    # batched dot_generals below (heads sit at dh-wide lane offsets after the
    # fused matmul, so this is the one unavoidable lane->head shuffle).
    # TODO(synk): at production head_dim (>=128) feed q/k/v per head via
    # BlockSpecs / a head grid axis instead of in-kernel slicing.
    qk16 = qk.astype(jnp.bfloat16)
    v16 = qkv[:, 2 * D:].astype(jnp.bfloat16)
    q = jnp.stack([qk16[:, h * dh:(h + 1) * dh] for h in range(H)], axis=0)
    k = jnp.stack([qk16[:, D + h * dh:D + (h + 1) * dh] for h in range(H)],
                  axis=0)
    v = jnp.stack([v16[:, h * dh:(h + 1) * dh] for h in range(H)], axis=0)

    # Attention for all heads with two batched MXU dot_generals.  bias is 0 on
    # each sequence's causal triangle and -1e9 elsewhere (also blocks
    # cross-sequence attention for the folded batch).
    s = jnp.einsum('hqd,hkd->hqk', q, k,
                   preferred_element_type=jnp.float32)           # (H, BT, BT)
    s = s + bias_ref[...][None]
    s = s - jnp.max(s, axis=-1, keepdims=True)
    p = jnp.exp(s)
    p = p * pl.reciprocal(jnp.sum(p, axis=-1, keepdims=True), approx=True)
    # TODO(synk): for production seq lens, tile the KV axis with an
    # online-softmax accumulator instead of materializing (BT, BT) scores
    # (critical for v7x's 64 MiB VMEM).
    ctx = jnp.einsum('hqk,hkd->hqd', p.astype(jnp.bfloat16), v,
                     preferred_element_type=jnp.float32)         # (H, BT, dh)

    # Merged-heads output layout (BT, H*dh): store each head straight into its
    # lane slice of the output block (no 8-way concatenate, bounded liveness).
    # At production head_dim the per-head store is naturally >=128 lanes wide.
    for h in range(H):
        o_ref[:, h * dh:(h + 1) * dh] = ctx[h].astype(o_ref.dtype)


def progen_zero_attention_pallas(hidden_states, qkv_weight, *, num_heads,
                                 head_dim, rotary_dim):
    B, T, D = hidden_states.shape
    H, dh = num_heads, head_dim
    mp = 8
    assert D == H * dh and H % mp == 0
    assert dh % 2 == 0, "head_dim must be even for the folded rotary tables"
    rd = dh if rotary_dim is None else rotary_dim
    assert rd % 2 == 0 and rd <= dh
    BT = B * T

    # --- glue: fold the module's fused-mp qkv weight layout into one (D, 3D)
    # matrix with head-major output columns [Q | K | V] (dh cols per head).
    # The torch fused layout per mp group is [q | v | k] (torch.split order).
    Wt = jnp.transpose(qkv_weight).reshape(D, mp, 3, H // mp, dh)
    Wq = Wt[:, :, 0].reshape(D, D)
    Wv = Wt[:, :, 1].reshape(D, D)
    Wk = Wt[:, :, 2].reshape(D, D)
    W_fused = jnp.concatenate([Wq, Wk, Wv], axis=1).astype(jnp.bfloat16)

    # --- glue: rotary tables with rotate_every_two's sign/select and the
    # 1/sqrt(head_dim) score scale folded in, shaped (B*T, 2D) to match the
    # folded-batch [q | k] slab.
    # TODO(synk): at production sizes keep (T, head_dim) tables and broadcast
    # in-kernel instead of tiling across heads/batch.
    inv_freq = 1.0 / (10000.0 ** (jnp.arange(0, rd, 2, dtype=jnp.float32) / rd))
    ang = jnp.arange(T, dtype=jnp.float32)[:, None] * inv_freq[None, :]
    sin = jnp.repeat(jnp.sin(ang), 2, axis=1)                       # (T, rd)
    cos = jnp.repeat(jnp.cos(ang), 2, axis=1)
    sin_dh = jnp.concatenate([sin, jnp.zeros((T, dh - rd), jnp.float32)], 1)
    cos_dh = jnp.concatenate([cos, jnp.ones((T, dh - rd), jnp.float32)], 1)
    even = (jnp.arange(dh) % 2) == 0
    sina_dh = jnp.where(even, -sin_dh, 0.0)      # multiplies the "next" lane
    sinb_dh = jnp.where(even, 0.0, sin_dh)       # multiplies the "prev" lane
    inv_scale = 1.0 / math.sqrt(float(dh))

    def qk_table(t):
        t = jnp.tile(t, (1, H))                                   # (T, D)
        t = jnp.concatenate([t * inv_scale, t], axis=1)           # (T, 2D)
        return jnp.tile(t, (B, 1))                                # (B*T, 2D)

    cos2, sina2, sinb2 = qk_table(cos_dh), qk_table(sina_dh), qk_table(sinb_dh)

    # --- glue: additive attention bias for the folded batch: 0 on each
    # sequence's causal triangle, -1e9 elsewhere (incl. cross-sequence).
    tok = jnp.arange(BT)
    same_seq = (tok[:, None] // T) == (tok[None, :] // T)
    causal = (tok[None, :] % T) <= (tok[:, None] % T)
    attn_bias = jnp.where(same_seq & causal, 0.0, -1e9).astype(jnp.float32)

    x2 = hidden_states.reshape(BT, D).astype(jnp.bfloat16)

    kernel = partial(_attention_kernel, num_heads=H, head_dim=dh)
    out = pl.pallas_call(
        kernel,
        out_shape=jax.ShapeDtypeStruct((BT, D), jnp.float32),
        grid=(1,),
        in_specs=[
            pl.BlockSpec((BT, D), lambda i: (0, 0)),          # activations
            pl.BlockSpec((D, 3 * D), lambda i: (0, 0)),       # fused weight
            pl.BlockSpec((BT, 2 * D), lambda i: (0, 0)),      # cos table
            pl.BlockSpec((BT, 2 * D), lambda i: (0, 0)),      # sin_a table
            pl.BlockSpec((BT, 2 * D), lambda i: (0, 0)),      # sin_b table
            pl.BlockSpec((BT, BT), lambda i: (0, 0)),         # additive bias
        ],
        out_specs=pl.BlockSpec((BT, D), lambda i: (0, 0)),
        compiler_params=pltpu.CompilerParams(
            dimension_semantics=("arbitrary",)),
        # TODO(synk): on multi-TensorCore chips (v7x) keep a batch/head grid
        # axis with pltpu.CORE_PARALLEL instead of a single invocation.
    )(x2, W_fused, cos2, sina2, sinb2, attn_bias)
    return out.reshape(B, T, D)                                   # (B, T, D)


# ---------------- pure-JAX reference mirroring the PyTorch code ---------------
def progen_zero_attention_ref(hidden_states, qkv_weight, *, num_heads,
                              head_dim, rotary_dim):
    B, T, D = hidden_states.shape
    mp = 8
    qkv = hidden_states @ qkv_weight.T
    qkv_split = qkv.reshape(B, T, mp, -1)
    local_dim = head_dim * num_heads // mp
    query = qkv_split[..., :local_dim]
    value = qkv_split[..., local_dim:2 * local_dim]
    key = qkv_split[..., 2 * local_dim:]

    def split_heads(t):
        r = t.reshape(B, T, mp, num_heads // mp, head_dim)
        return r.reshape(B, T, num_heads, head_dim)

    query, key, value = split_heads(query), split_heads(key), split_heads(value)
    value = jnp.transpose(value, (0, 2, 1, 3))

    def fixed_pos_embedding(dim, seq_len):
        inv_freq = 1.0 / 10000.0 ** (jnp.arange(0, dim, 2, dtype=jnp.float32) / dim)
        sinusoid = jnp.einsum('i,j->ij', jnp.arange(seq_len, dtype=jnp.float32),
                              inv_freq).astype(jnp.float32)
        return jnp.sin(sinusoid), jnp.cos(sinusoid)

    def rotate_every_two(x):
        x1 = x[:, :, :, ::2]
        x2 = x[:, :, :, 1::2]
        st = jnp.stack((-x2, x1), axis=-1)
        return st.reshape(st.shape[:-2] + (-1,))

    def apply_rotary(x, sincos):
        sin, cos = [jnp.repeat(t[None, :x.shape[1], None, :], 2, axis=3)
                    for t in sincos]
        return x * cos + rotate_every_two(x) * sin

    if rotary_dim is not None:
        k_rot, k_pass = key[..., :rotary_dim], key[..., rotary_dim:]
        q_rot, q_pass = query[..., :rotary_dim], query[..., rotary_dim:]
        sincos = fixed_pos_embedding(rotary_dim, T)
        key = jnp.concatenate([apply_rotary(k_rot, sincos), k_pass], axis=-1)
        query = jnp.concatenate([apply_rotary(q_rot, sincos), q_pass], axis=-1)
    else:
        sincos = fixed_pos_embedding(head_dim, T)
        key = apply_rotary(key, sincos)
        query = apply_rotary(query, sincos)

    key = jnp.transpose(key, (0, 2, 1, 3))
    query = jnp.transpose(query, (0, 2, 1, 3))

    scale = jnp.sqrt(jnp.float32(head_dim))
    w = jnp.einsum('bhqd,bhkd->bhqk', query, key) / scale
    causal = jnp.tril(jnp.ones((T, T), bool))[None, None]
    w = jnp.where(causal, w, jnp.float32(-1e9))
    w = jax.nn.softmax(w, axis=-1)
    attn_output = jnp.einsum('bhqk,bhkd->bhqd', w, value)
    return jnp.transpose(attn_output, (0, 2, 1, 3)).reshape(B, T, D)


if __name__ == "__main__":
    # config: hidden_size=64, num_attention_heads=8, rotary_dim=4,
    #         max_position_embeddings >= seq_len; batch=2, seq=16.
    B, T, D = 2, 16, 64
    H, dh, rd = 8, 8, 4

    kx, kw = jax.random.split(jax.random.PRNGKey(0))
    x = jax.random.normal(kx, (B, T, D), dtype=jnp.float32)
    # (module's init_weights() zeroes this weight; random-but-deterministic
    #  values keep the math identical while being non-trivial)
    W = jax.random.normal(kw, (3 * D, D), dtype=jnp.float32) * 0.02

    out = progen_zero_attention_pallas(x, W, num_heads=H, head_dim=dh,
                                       rotary_dim=rd)
    out = jax.block_until_ready(out)

    ref = progen_zero_attention_ref(x, W, num_heads=H, head_dim=dh,
                                    rotary_dim=rd)
    # tolerance loosened for bf16 MXU operands (f32 accumulation).
    np.testing.assert_allclose(np.asarray(out), np.asarray(ref),
                               rtol=2e-2, atol=1e-2)
    print("KERNEL_OK")
</pallas_src>

<mosaic_0001>
module attributes {stable_mosaic.version = 11 : i64} {
  func.func @_attention_kernel(%arg0: i32, %arg1: memref<32x64xbf16, #tpu.memory_space<vmem>>, %arg2: memref<64x192xbf16, #tpu.memory_space<vmem>>, %arg3: memref<32x128xf32, #tpu.memory_space<vmem>>, %arg4: memref<32x128xf32, #tpu.memory_space<vmem>>, %arg5: memref<32x128xf32, #tpu.memory_space<vmem>>, %arg6: memref<32x32xf32, #tpu.memory_space<vmem>>, %arg7: memref<32x64xf32, #tpu.memory_space<vmem>>) attributes {dimension_semantics = [#tpu.dimension_semantics<arbitrary>], iteration_bounds = array<i64: 1>, scalar_prefetch = 0 : i64, scratch_operands = 0 : i64, tpu.core_type = #tpu.core_type<tc>, window_params = [{pipeline_mode = #tpu.pipeline_mode<synchronous>, transform_indices = @transform_0, window_bounds = array<i64: 32, 64>}, {pipeline_mode = #tpu.pipeline_mode<synchronous>, transform_indices = @transform_1, window_bounds = array<i64: 64, 192>}, {pipeline_mode = #tpu.pipeline_mode<synchronous>, transform_indices = @transform_2, window_bounds = array<i64: 32, 128>}, {pipeline_mode = #tpu.pipeline_mode<synchronous>, transform_indices = @transform_3, window_bounds = array<i64: 32, 128>}, {pipeline_mode = #tpu.pipeline_mode<synchronous>, transform_indices = @transform_4, window_bounds = array<i64: 32, 128>}, {pipeline_mode = #tpu.pipeline_mode<synchronous>, transform_indices = @transform_5, window_bounds = array<i64: 32, 32>}, {pipeline_mode = #tpu.pipeline_mode<synchronous>, transform_indices = @transform_6, window_bounds = array<i64: 32, 64>}]} {
    %c0 = arith.constant 0 : index
    %c0_0 = arith.constant 0 : index
    %0 = vector.load %arg1[%c0, %c0_0] : memref<32x64xbf16, #tpu.memory_space<vmem>>, vector<32x64xbf16>
    %c0_1 = arith.constant 0 : index
    %c0_2 = arith.constant 0 : index
    %1 = vector.load %arg2[%c0_1, %c0_2] : memref<64x192xbf16, #tpu.memory_space<vmem>>, vector<64x192xbf16>
    %cst = arith.constant dense<0.000000e+00> : vector<32x192xf32>
    %2 = tpu.matmul %0, %1, %cst {dimension_numbers = #tpu.dot_dimension_numbers<[1], [0], [0], [1], [0, 0, 1, 1], [], []>} : vector<32x64xbf16>, vector<64x192xbf16>, vector<32x192xf32> -> vector<32x192xf32>
    %3 = vector.extract_strided_slice %2 {offsets = [0, 0], sizes = [32, 128], strides = [1, 1]} : vector<32x192xf32> to vector<32x128xf32>
    %4 = vector.extract_strided_slice %3 {offsets = [0, 1], sizes = [32, 127], strides = [1, 1]} : vector<32x128xf32> to vector<32x127xf32>
    %5 = vector.extract_strided_slice %3 {offsets = [0, 0], sizes = [32, 1], strides = [1, 1]} : vector<32x128xf32> to vector<32x1xf32>
    %6 = tpu.concatenate %4, %5 in 1 : vector<32x127xf32>, vector<32x1xf32> -> vector<32x128xf32>
    %7 = vector.extract_strided_slice %3 {offsets = [0, 127], sizes = [32, 1], strides = [1, 1]} : vector<32x128xf32> to vector<32x1xf32>
    %8 = vector.extract_strided_slice %3 {offsets = [0, 0], sizes = [32, 127], strides = [1, 1]} : vector<32x128xf32> to vector<32x127xf32>
    %9 = tpu.concatenate %7, %8 in 1 : vector<32x1xf32>, vector<32x127xf32> -> vector<32x128xf32>
    %c0_3 = arith.constant 0 : index
    %c0_4 = arith.constant 0 : index
    %10 = vector.load %arg3[%c0_3, %c0_4] : memref<32x128xf32, #tpu.memory_space<vmem>>, vector<32x128xf32>
    %11 = arith.mulf %3, %10 : vector<32x128xf32>
    %c0_5 = arith.constant 0 : index
    %c0_6 = arith.constant 0 : index
    %12 = vector.load %arg4[%c0_5, %c0_6] : memref<32x128xf32, #tpu.memory_space<vmem>>, vector<32x128xf32>
    %13 = arith.mulf %6, %12 : vector<32x128xf32>
    %14 = arith.addf %11, %13 : vector<32x128xf32>
    %c0_7 = arith.constant 0 : index
    %c0_8 = arith.constant 0 : index
    %15 = vector.load %arg5[%c0_7, %c0_8] : memref<32x128xf32, #tpu.memory_space<vmem>>, vector<32x128xf32>
    %16 = arith.mulf %9, %15 : vector<32x128xf32>
    %17 = arith.addf %14, %16 : vector<32x128xf32>
    %18 = arith.truncf %17 : vector<32x128xf32> to vector<32x128xbf16>
    %19 = vector.extract_strided_slice %2 {offsets = [0, 128], sizes = [32, 64], strides = [1, 1]} : vector<32x192xf32> to vector<32x64xf32>
    %20 = arith.truncf %19 : vector<32x64xf32> to vector<32x64xbf16>
    %21 = vector.extract_strided_slice %18 {offsets = [0, 0], sizes = [32, 8], strides = [1, 1]} : vector<32x128xbf16> to vector<32x8xbf16>
    %22 = vector.extract_strided_slice %18 {offsets = [0, 8], sizes = [32, 8], strides = [1, 1]} : vector<32x128xbf16> to vector<32x8xbf16>
    %23 = vector.extract_strided_slice %18 {offsets = [0, 16], sizes = [32, 8], strides = [1, 1]} : vector<32x128xbf16> to vector<32x8xbf16>
    %24 = vector.extract_strided_slice %18 {offsets = [0, 24], sizes = [32, 8], strides = [1, 1]} : vector<32x128xbf16> to vector<32x8xbf16>
    %25 = vector.extract_strided_slice %18 {offsets = [0, 32], sizes = [32, 8], strides = [1, 1]} : vector<32x128xbf16> to vector<32x8xbf16>
    %26 = vector.extract_strided_slice %18 {offsets = [0, 40], sizes = [32, 8], strides = [1, 1]} : vector<32x128xbf16> to vector<32x8xbf16>
    %27 = vector.extract_strided_slice %18 {offsets = [0, 48], sizes = [32, 8], strides = [1, 1]} : vector<32x128xbf16> to vector<32x8xbf16>
    %28 = vector.extract_strided_slice %18 {offsets = [0, 56], sizes = [32, 8], strides = [1, 1]} : vector<32x128xbf16> to vector<32x8xbf16>
    %29 = vector.shape_cast %21 : vector<32x8xbf16> to vector<1x32x8xbf16>
    %30 = vector.shape_cast %22 : vector<32x8xbf16> to vector<1x32x8xbf16>
    %31 = vector.shape_cast %23 : vector<32x8xbf16> to vector<1x32x8xbf16>
    %32 = vector.shape_cast %24 : vector<32x8xbf16> to vector<1x32x8xbf16>
    %33 = vector.shape_cast %25 : vector<32x8xbf16> to vector<1x32x8xbf16>
    %34 = vector.shape_cast %26 : vector<32x8xbf16> to vector<1x32x8xbf16>
    %35 = vector.shape_cast %27 : vector<32x8xbf16> to vector<1x32x8xbf16>
    %36 = vector.shape_cast %28 : vector<32x8xbf16> to vector<1x32x8xbf16>
    %37 = tpu.concatenate %29, %30, %31, %32, %33, %34, %35, %36 in 0 : vector<1x32x8xbf16>, vector<1x32x8xbf16>, vector<1x32x8xbf16>, vector<1x32x8xbf16>, vector<1x32x8xbf16>, vector<1x32x8xbf16>, vector<1x32x8xbf16>, vector<1x32x8xbf16> -> vector<8x32x8xbf16>
    %38 = vector.extract_strided_slice %18 {offsets = [0, 64], sizes = [32, 8], strides = [1, 1]} : vector<32x128xbf16> to vector<32x8xbf16>
    %39 = vector.extract_strided_slice %18 {offsets = [0, 72], sizes = [32, 8], strides = [1, 1]} : vector<32x128xbf16> to vector<32x8xbf16>
    %40 = vector.extract_strided_slice %18 {offsets = [0, 80], sizes = [32, 8], strides = [1, 1]} : vector<32x128xbf16> to vector<32x8xbf16>
    %41 = vector.extract_strided_slice %18 {offsets = [0, 88], sizes = [32, 8], strides = [1, 1]} : vector<32x128xbf16> to vector<32x8xbf16>
    %42 = vector.extract_strided_slice %18 {offsets = [0, 96], sizes = [32, 8], strides = [1, 1]} : vector<32x128xbf16> to vector<32x8xbf16>
    %43 = vector.extract_strided_slice %18 {offsets = [0, 104], sizes = [32, 8], strides = [1, 1]} : vector<32x128xbf16> to vector<32x8xbf16>
    %44 = vector.extract_strided_slice %18 {offsets = [0, 112], sizes = [32, 8], strides = [1, 1]} : vector<32x128xbf16> to vector<32x8xbf16>
    %45 = vector.extract_strided_slice %18 {offsets = [0, 120], sizes = [32, 8], strides = [1, 1]} : vector<32x128xbf16> to vector<32x8xbf16>
    %46 = vector.shape_cast %38 : vector<32x8xbf16> to vector<1x32x8xbf16>
    %47 = vector.shape_cast %39 : vector<32x8xbf16> to vector<1x32x8xbf16>
    %48 = vector.shape_cast %40 : vector<32x8xbf16> to vector<1x32x8xbf16>
    %49 = vector.shape_cast %41 : vector<32x8xbf16> to vector<1x32x8xbf16>
    %50 = vector.shape_cast %42 : vector<32x8xbf16> to vector<1x32x8xbf16>
    %51 = vector.shape_cast %43 : vector<32x8xbf16> to vector<1x32x8xbf16>
    %52 = vector.shape_cast %44 : vector<32x8xbf16> to vector<1x32x8xbf16>
    %53 = vector.shape_cast %45 : vector<32x8xbf16> to vector<1x32x8xbf16>
    %54 = tpu.concatenate %46, %47, %48, %49, %50, %51, %52, %53 in 0 : vector<1x32x8xbf16>, vector<1x32x8xbf16>, vector<1x32x8xbf16>, vector<1x32x8xbf16>, vector<1x32x8xbf16>, vector<1x32x8xbf16>, vector<1x32x8xbf16>, vector<1x32x8xbf16> -> vector<8x32x8xbf16>
    %55 = vector.extract_strided_slice %20 {offsets = [0, 0], sizes = [32, 8], strides = [1, 1]} : vector<32x64xbf16> to vector<32x8xbf16>
    %56 = vector.extract_strided_slice %20 {offsets = [0, 8], sizes = [32, 8], strides = [1, 1]} : vector<32x64xbf16> to vector<32x8xbf16>
    %57 = vector.extract_strided_slice %20 {offsets = [0, 16], sizes = [32, 8], strides = [1, 1]} : vector<32x64xbf16> to vector<32x8xbf16>
    %58 = vector.extract_strided_slice %20 {offsets = [0, 24], sizes = [32, 8], strides = [1, 1]} : vector<32x64xbf16> to vector<32x8xbf16>
    %59 = vector.extract_strided_slice %20 {offsets = [0, 32], sizes = [32, 8], strides = [1, 1]} : vector<32x64xbf16> to vector<32x8xbf16>
    %60 = vector.extract_strided_slice %20 {offsets = [0, 40], sizes = [32, 8], strides = [1, 1]} : vector<32x64xbf16> to vector<32x8xbf16>
    %61 = vector.extract_strided_slice %20 {offsets = [0, 48], sizes = [32, 8], strides = [1, 1]} : vector<32x64xbf16> to vector<32x8xbf16>
    %62 = vector.extract_strided_slice %20 {offsets = [0, 56], sizes = [32, 8], strides = [1, 1]} : vector<32x64xbf16> to vector<32x8xbf16>
    %63 = vector.shape_cast %55 : vector<32x8xbf16> to vector<1x32x8xbf16>
    %64 = vector.shape_cast %56 : vector<32x8xbf16> to vector<1x32x8xbf16>
    %65 = vector.shape_cast %57 : vector<32x8xbf16> to vector<1x32x8xbf16>
    %66 = vector.shape_cast %58 : vector<32x8xbf16> to vector<1x32x8xbf16>
    %67 = vector.shape_cast %59 : vector<32x8xbf16> to vector<1x32x8xbf16>
    %68 = vector.shape_cast %60 : vector<32x8xbf16> to vector<1x32x8xbf16>
    %69 = vector.shape_cast %61 : vector<32x8xbf16> to vector<1x32x8xbf16>
    %70 = vector.shape_cast %62 : vector<32x8xbf16> to vector<1x32x8xbf16>
    %71 = tpu.concatenate %63, %64, %65, %66, %67, %68, %69, %70 in 0 : vector<1x32x8xbf16>, vector<1x32x8xbf16>, vector<1x32x8xbf16>, vector<1x32x8xbf16>, vector<1x32x8xbf16>, vector<1x32x8xbf16>, vector<1x32x8xbf16>, vector<1x32x8xbf16> -> vector<8x32x8xbf16>
    "tpu.trace_start"() <{level = 10 : i32, message = "hqd,hkd->hqk"}> : () -> ()
    %cst_9 = arith.constant dense<0.000000e+00> : vector<8x32x32xf32>
    %72 = tpu.matmul %37, %54, %cst_9 {dimension_numbers = #tpu.dot_dimension_numbers<[2], [2], [1], [1], [0, 0, 0, 1, 1, 1], [0], [0]>} : vector<8x32x8xbf16>, vector<8x32x8xbf16>, vector<8x32x32xf32> -> vector<8x32x32xf32>
    "tpu.trace_stop"() : () -> ()
    %c0_10 = arith.constant 0 : index
    %c0_11 = arith.constant 0 : index
    %73 = vector.load %arg6[%c0_10, %c0_11] : memref<32x32xf32, #tpu.memory_space<vmem>>, vector<32x32xf32>
    %74 = vector.shape_cast %73 : vector<32x32xf32> to vector<1x32x32xf32>
    %75 = vector.broadcast %74 : vector<1x32x32xf32> to vector<8x32x32xf32>
    %76 = arith.addf %72, %75 : vector<8x32x32xf32>
    %cst_12 = arith.constant dense<0xFF800000> : vector<8x32xf32>
    %77 = vector.multi_reduction <maximumf>, %76, %cst_12 [2] : vector<8x32x32xf32> to vector<8x32xf32>
    %78 = vector.shape_cast %77 : vector<8x32xf32> to vector<8x32x1xf32>
    %79 = vector.broadcast %78 : vector<8x32x1xf32> to vector<8x32x32xf32>
    %80 = arith.subf %76, %79 : vector<8x32x32xf32>
    %81 = math.exp %80 : vector<8x32x32xf32>
    %cst_13 = arith.constant dense<0.000000e+00> : vector<8x32xf32>
    %82 = vector.multi_reduction <add>, %81, %cst_13 [2] : vector<8x32x32xf32> to vector<8x32xf32>
    %83 = vector.shape_cast %82 : vector<8x32xf32> to vector<8x32x1xf32>
    %84 = tpu.reciprocal %83 {approx = true} : vector<8x32x1xf32> -> vector<8x32x1xf32>
    %85 = vector.broadcast %84 : vector<8x32x1xf32> to vector<8x32x32xf32>
    %86 = arith.mulf %81, %85 : vector<8x32x32xf32>
    %87 = arith.truncf %86 : vector<8x32x32xf32> to vector<8x32x32xbf16>
    "tpu.trace_start"() <{level = 10 : i32, message = "hqk,hkd->hqd"}> : () -> ()
    %cst_14 = arith.constant dense<0.000000e+00> : vector<8x32x8xf32>
    %88 = tpu.matmul %87, %71, %cst_14 {dimension_numbers = #tpu.dot_dimension_numbers<[2], [1], [1], [2], [0, 0, 0, 1, 1, 2], [0], [0]>} : vector<8x32x32xbf16>, vector<8x32x8xbf16>, vector<8x32x8xf32> -> vector<8x32x8xf32>
    "tpu.trace_stop"() : () -> ()
    %89 = vector.extract_strided_slice %88 {offsets = [0, 0, 0], sizes = [1, 32, 8], strides = [1, 1, 1]} : vector<8x32x8xf32> to vector<1x32x8xf32>
    %90 = vector.shape_cast %89 : vector<1x32x8xf32> to vector<32x8xf32>
    %c0_15 = arith.constant 0 : index
    %c0_16 = arith.constant 0 : index
    %91 = vector.load %arg7[%c0_15, %c0_16] : memref<32x64xf32, #tpu.memory_space<vmem>>, vector<32x8xf32>
    tpu.vector_store %arg7[%c0_15, %c0_16], %90 {strides = array<i32>} : memref<32x64xf32, #tpu.memory_space<vmem>>, vector<32x8xf32>,
    %92 = vector.extract_strided_slice %88 {offsets = [1, 0, 0], sizes = [1, 32, 8], strides = [1, 1, 1]} : vector<8x32x8xf32> to vector<1x32x8xf32>
    %93 = vector.shape_cast %92 : vector<1x32x8xf32> to vector<32x8xf32>
    %c0_17 = arith.constant 0 : index
    %c8 = arith.constant 8 : index
    %94 = vector.load %arg7[%c0_17, %c8] : memref<32x64xf32, #tpu.memory_space<vmem>>, vector<32x8xf32>
    tpu.vector_store %arg7[%c0_17, %c8], %93 {strides = array<i32>} : memref<32x64xf32, #tpu.memory_space<vmem>>, vector<32x8xf32>,
    %95 = vector.extract_strided_slice %88 {offsets = [2, 0, 0], sizes = [1, 32, 8], strides = [1, 1, 1]} : vector<8x32x8xf32> to vector<1x32x8xf32>
    %96 = vector.shape_cast %95 : vector<1x32x8xf32> to vector<32x8xf32>
    %c0_18 = arith.constant 0 : index
    %c16 = arith.constant 16 : index
    %97 = vector.load %arg7[%c0_18, %c16] : memref<32x64xf32, #tpu.memory_space<vmem>>, vector<32x8xf32>
    tpu.vector_store %arg7[%c0_18, %c16], %96 {strides = array<i32>} : memref<32x64xf32, #tpu.memory_space<vmem>>, vector<32x8xf32>,
    %98 = vector.extract_strided_slice %88 {offsets = [3, 0, 0], sizes = [1, 32, 8], strides = [1, 1, 1]} : vector<8x32x8xf32> to vector<1x32x8xf32>
    %99 = vector.shape_cast %98 : vector<1x32x8xf32> to vector<32x8xf32>
    %c0_19 = arith.constant 0 : index
    %c24 = arith.constant 24 : index
    %100 = vector.load %arg7[%c0_19, %c24] : memref<32x64xf32, #tpu.memory_space<vmem>>, vector<32x8xf32>
    tpu.vector_store %arg7[%c0_19, %c24], %99 {strides = array<i32>} : memref<32x64xf32, #tpu.memory_space<vmem>>, vector<32x8xf32>,
    %101 = vector.extract_strided_slice %88 {offsets = [4, 0, 0], sizes = [1, 32, 8], strides = [1, 1, 1]} : vector<8x32x8xf32> to vector<1x32x8xf32>
    %102 = vector.shape_cast %101 : vector<1x32x8xf32> to vector<32x8xf32>
    %c0_20 = arith.constant 0 : index
    %c32 = arith.constant 32 : index
    %103 = vector.load %arg7[%c0_20, %c32] : memref<32x64xf32, #tpu.memory_space<vmem>>, vector<32x8xf32>
    tpu.vector_store %arg7[%c0_20, %c32], %102 {strides = array<i32>} : memref<32x64xf32, #tpu.memory_space<vmem>>, vector<32x8xf32>,
    %104 = vector.extract_strided_slice %88 {offsets = [5, 0, 0], sizes = [1, 32, 8], strides = [1, 1, 1]} : vector<8x32x8xf32> to vector<1x32x8xf32>
    %105 = vector.shape_cast %104 : vector<1x32x8xf32> to vector<32x8xf32>
    %c0_21 = arith.constant 0 : index
    %c40 = arith.constant 40 : index
    %106 = vector.load %arg7[%c0_21, %c40] : memref<32x64xf32, #tpu.memory_space<vmem>>, vector<32x8xf32>
    tpu.vector_store %arg7[%c0_21, %c40], %105 {strides = array<i32>} : memref<32x64xf32, #tpu.memory_space<vmem>>, vector<32x8xf32>,
    %107 = vector.extract_strided_slice %88 {offsets = [6, 0, 0], sizes = [1, 32, 8], strides = [1, 1, 1]} : vector<8x32x8xf32> to vector<1x32x8xf32>
    %108 = vector.shape_cast %107 : vector<1x32x8xf32> to vector<32x8xf32>
    %c0_22 = arith.constant 0 : index
    %c48 = arith.constant 48 : index
    %109 = vector.load %arg7[%c0_22, %c48] : memref<32x64xf32, #tpu.memory_space<vmem>>, vector<32x8xf32>
    tpu.vector_store %arg7[%c0_22, %c48], %108 {strides = array<i32>} : memref<32x64xf32, #tpu.memory_space<vmem>>, vector<32x8xf32>,
    %110 = vector.extract_strided_slice %88 {offsets = [7, 0, 0], sizes = [1, 32, 8], strides = [1, 1, 1]} : vector<8x32x8xf32> to vector<1x32x8xf32>
    %111 = vector.shape_cast %110 : vector<1x32x8xf32> to vector<32x8xf32>
    %c0_23 = arith.constant 0 : index
    %c56 = arith.constant 56 : index
    %112 = vector.load %arg7[%c0_23, %c56] : memref<32x64xf32, #tpu.memory_space<vmem>>, vector<32x8xf32>
    tpu.vector_store %arg7[%c0_23, %c56], %111 {strides = array<i32>} : memref<32x64xf32, #tpu.memory_space<vmem>>, vector<32x8xf32>,
    return
  }
  func.func @transform_0(%arg0: i32) -> (i32, i32) {
    %c0_i32 = arith.constant 0 : i32
    %c0_i32_0 = arith.constant 0 : i32
    %c0_i32_1 = arith.constant 0 : i32
    return %c0_i32, %c0_i32_0 : i32, i32
  }
  func.func @transform_1(%arg0: i32) -> (i32, i32) {
    %c0_i32 = arith.constant 0 : i32
    %c0_i32_0 = arith.constant 0 : i32
    %c0_i32_1 = arith.constant 0 : i32
    return %c0_i32, %c0_i32_0 : i32, i32
  }
  func.func @transform_2(%arg0: i32) -> (i32, i32) {
    %c0_i32 = arith.constant 0 : i32
    %c0_i32_0 = arith.constant 0 : i32
    %c0_i32_1 = arith.constant 0 : i32
    return %c0_i32, %c0_i32_0 : i32, i32
  }
  func.func @transform_3(%arg0: i32) -> (i32, i32) {
    %c0_i32 = arith.constant 0 : i32
    %c0_i32_0 = arith.constant 0 : i32
    %c0_i32_1 = arith.constant 0 : i32
    return %c0_i32, %c0_i32_0 : i32, i32
  }
  func.func @transform_4(%arg0: i32) -> (i32, i32) {
    %c0_i32 = arith.constant 0 : i32
    %c0_i32_0 = arith.constant 0 : i32
    %c0_i32_1 = arith.constant 0 : i32
    return %c0_i32, %c0_i32_0 : i32, i32
  }
  func.func @transform_5(%arg0: i32) -> (i32, i32) {
    %c0_i32 = arith.constant 0 : i32
    %c0_i32_0 = arith.constant 0 : i32
    %c0_i32_1 = arith.constant 0 : i32
    return %c0_i32, %c0_i32_0 : i32, i32
  }
  func.func @transform_6(%arg0: i32) -> (i32, i32) {
    %c0_i32 = arith.constant 0 : i32
    %c0_i32_0 = arith.constant 0 : i32
    %c0_i32_1 = arith.constant 0 : i32
    return %c0_i32, %c0_i32_0 : i32, i32
  }
}

</mosaic_0001>

<bundles_post_ra>
// kernel: tpu_custom_call.1
= control target key start
LH: loop header
LB: loop body
LE: loop exit
PB: predicated region body
PF: predicated region fallthrough
CT: control target
= control target key end

     0   :  { %11 = vsyncpa [#allocation3], 0  ;;  %s3220_s0 = inlined_call_operand.hbm [shape: bf16[32,64], index: 0, kind: input, shape index: {}]   ;;  %s3221_s1 = inlined_call_operand.hbm [shape: bf16[64,192], index: 1, kind: input, shape index: {}]   ;;  %s3222_s2 = inlined_call_operand.hbm [shape: f32[32,128], index: 2, kind: input, shape index: {}]   ;;  %s3223_s3 = inlined_call_operand.hbm [shape: f32[32,128], index: 3, kind: input, shape index: {}]   ;;  %s3224_s4 = inlined_call_operand.hbm [shape: f32[32,128], index: 4, kind: input, shape index: {}]   ;;  %s3225_s5 = inlined_call_operand.hbm [shape: f32[32,32], index: 5, kind: input, shape index: {}]   ;;  %s3226_s6 = inlined_call_operand.hbm [shape: f32[32,64], index: 6, kind: output, shape index: {}]  }
   0x1   :  { %12 = vsyncpa [#allocation6], 0 }
   0x2   :  { %13 = vsyncpa [#allocation9], 0 }
   0x3   :  { %14 = vsyncpa [#allocation12], 0 }
   0x4   :  { %15 = vsyncpa [#allocation4], 0  ;;  %s2457_s21 = smov [#allocation5]   ;;  %s2293_s25 = scalar_lea.hbm %s3221_s1, 1024 }
   0x5   :  { %s33_s22 = sshll.u32 %s2457_s21, 4  ;;  %p2294_p0 = scmp.ne.s32.totalorder %s3221_s1, %s2293_s25  ;;  %s34_s22 = int_to_ptr.vmem [resolvable:$true] %s33_s22 }
   0x6   :  { %p2297_p1 = scmp.lt.u32.totalorder %s2293_s25, %s3221_s1 }
   0x8   :  { %p2299_p2 = pnand %p2297_p1, %p2294_p0 }
   0xa   :  { %2302 = shalt.err (!%p2299_p2)
}
   0xb   :  { %s2303_s30 = scalar_lea.vmem %s34_s22, 1024  ;;  %p2308_p4 = scmp.lt.s32.totalorder %s34_s22, %s34_s22 }
   0xc   :  { %p2304_p3 = scmp.ne.s32.totalorder %s34_s22, %s2303_s30  ;;  %p2309_p5 = scmp.lt.s32.totalorder %s2303_s30, %s2303_s30 }
   0xe   :  { %p2310_p6 = por %p2309_p5, %p2308_p4 }
  0x10   :  { %p2311_p7 = pnand %p2310_p6, %p2304_p3 }
  0x12   :  { %2314 = shalt.err (!%p2311_p7)
}
  0x13   :  { %s2458_s7 = smov 128   ;;  %s2459_s8 = smov 8  }
  0x14   :  { %39 = dma.hbm_to_vmem [thread:$0]  %s3221_s1, 1024, %s34_s22, [#allocation6], %s2458_s7, %s2458_s7, %s2459_s8  }
  0x15   :  { %s2460_s11 = smov [#allocation8]   ;;  %s2461_s13 = smov [#allocation2]  }
  0x16   :  { %s57_s12 = sshll.u32 %s2460_s11, 4  ;;  %s21_s14 = sshll.u32 %s2461_s13, 4  ;;  %s58_s12 = int_to_ptr.vmem [resolvable:$true] %s57_s12  ;;  %s22_s14 = int_to_ptr.vmem [resolvable:$true] %s21_s14 }
  0x17   :  { %s2315_s17 = scalar_lea.hbm %s3223_s3, 512 }
  0x18   :  { %p2316_p8 = scmp.ne.s32.totalorder %s3223_s3, %s2315_s17  ;;  %p2319_p9 = scmp.lt.u32.totalorder %s2315_s17, %s3223_s3 }
  0x1a   :  { %p2321_p10 = pnand %p2319_p9, %p2316_p8 }
  0x1c   :  { %2324 = shalt.err (!%p2321_p10)
}
  0x1d   :  { %s2325_s1 = scalar_lea.vmem %s58_s12, 512  ;;  %p2330_p12 = scmp.lt.s32.totalorder %s58_s12, %s58_s12 }
  0x1e   :  { %p2326_p11 = scmp.ne.s32.totalorder %s58_s12, %s2325_s1  ;;  %p2331_p13 = scmp.lt.s32.totalorder %s2325_s1, %s2325_s1 }
  0x20   :  { %p2332_p0 = por %p2331_p13, %p2330_p12 }
  0x22   :  { %p2333_p1 = pnand %p2332_p0, %p2326_p11 }
  0x24   :  { %2336 = shalt.err (!%p2333_p1)
}
  0x25   :  { %63 = dma.hbm_to_vmem [thread:$0]  %s3223_s3, 512, %s58_s12, [#allocation9], %s2458_s7, %s2458_s7, %s2459_s8  }
  0x26   :  { %s2337_s26 = scalar_lea.hbm %s3220_s0, 256 }
  0x27   :  { %p2338_p2 = scmp.ne.s32.totalorder %s3220_s0, %s2337_s26  ;;  %p2341_p3 = scmp.lt.u32.totalorder %s2337_s26, %s3220_s0 }
  0x29   :  { %p2343_p4 = pnand %p2341_p3, %p2338_p2 }
  0x2b   :  { %2346 = shalt.err (!%p2343_p4)
}
  0x2c   :  { %s2347_s9 = scalar_lea.vmem %s22_s14, 256  ;;  %p2352_p6 = scmp.lt.s32.totalorder %s22_s14, %s22_s14 }
  0x2d   :  { %p2348_p5 = scmp.ne.s32.totalorder %s22_s14, %s2347_s9  ;;  %p2353_p7 = scmp.lt.s32.totalorder %s2347_s9, %s2347_s9 }
  0x2f   :  { %p2354_p8 = por %p2353_p7, %p2352_p6 }
  0x31   :  { %p2355_p9 = pnand %p2354_p8, %p2348_p5 }
  0x33   :  { %2358 = shalt.err (!%p2355_p9)
}
  0x34   :  { %s2462_s3 = smov 64   ;;  %s2463_s10 = smov 4  }
  0x35   :  { %27 = dma.hbm_to_vmem [thread:$0]  %s3220_s0, 256, %s22_s14, [#allocation3], %s2462_s3, %s2462_s3, %s2463_s10  }
  0x36   :  { %s2464_s13 = smov [#allocation7]   ;;  %s2465_s16 = smov [#allocation10]  }
  0x37   :  { %s45_s15 = sshll.u32 %s2464_s13, 4  ;;  %s69_s17 = sshll.u32 %s2465_s16, 4  ;;  %s46_s15 = int_to_ptr.vmem [resolvable:$true] %s45_s15  ;;  %s70_s17 = int_to_ptr.vmem [resolvable:$true] %s69_s17 }
  0x38   :  { %s2359_s20 = scalar_lea.hbm %s3222_s2, 512 }
  0x39   :  { %p2360_p10 = scmp.ne.s32.totalorder %s3222_s2, %s2359_s20  ;;  %p2363_p11 = scmp.lt.u32.totalorder %s2359_s20, %s3222_s2 }
  0x3b   :  { %p2365_p12 = pnand %p2363_p11, %p2360_p10 }
  0x3d   :  { %2368 = shalt.err (!%p2365_p12)
}
  0x3e   :  { %s2369_s0 = scalar_lea.vmem %s46_s15, 512  ;;  %p2374_p0 = scmp.lt.s32.totalorder %s46_s15, %s46_s15 }
  0x3f   :  { %p2370_p13 = scmp.ne.s32.totalorder %s46_s15, %s2369_s0  ;;  %p2375_p1 = scmp.lt.s32.totalorder %s2369_s0, %s2369_s0 }
  0x41   :  { %p2376_p2 = por %p2375_p1, %p2374_p0 }
  0x43   :  { %p2377_p3 = pnand %p2376_p2, %p2370_p13 }
  0x45   :  { %2380 = shalt.err (!%p2377_p3)
}
  0x46   :  { %51 = dma.hbm_to_vmem [thread:$0]  %s3222_s2, 512, %s46_s15, [#allocation6], %s2458_s7, %s2458_s7, %s2459_s8  }
  0x47   :  { %s2381_s27 = scalar_lea.hbm %s3224_s4, 512 }
  0x48   :  { %p2382_p4 = scmp.ne.s32.totalorder %s3224_s4, %s2381_s27  ;;  %p2385_p5 = scmp.lt.u32.totalorder %s2381_s27, %s3224_s4 }
  0x4a   :  { %p2387_p6 = pnand %p2385_p5, %p2382_p4 }
  0x4c   :  { %2390 = shalt.err (!%p2387_p6)
}
  0x4d   :  { %s2391_s10 = scalar_lea.vmem %s70_s17, 512  ;;  %p2396_p8 = scmp.lt.s32.totalorder %s70_s17, %s70_s17 }
  0x4e   :  { %p2392_p7 = scmp.ne.s32.totalorder %s70_s17, %s2391_s10  ;;  %p2397_p9 = scmp.lt.s32.totalorder %s2391_s10, %s2391_s10 }
  0x50   :  { %p2398_p10 = por %p2397_p9, %p2396_p8 }
  0x52   :  { %p2399_p11 = pnand %p2398_p10, %p2392_p7 }
  0x54   :  { %2402 = shalt.err (!%p2399_p11)
}
  0x55   :  { %75 = dma.hbm_to_vmem [thread:$0]  %s3224_s4, 512, %s70_s17, [#allocation9], %s2458_s7, %s2458_s7, %s2459_s8  }
  0x56   :  { %s2466_s12 = smov [#allocation11]   ;;  %s2403_s18 = scalar_lea.hbm %s3225_s5, 512 }
  0x57   :  { %s81_s13 = sshll.u32 %s2466_s12, 4  ;;  %p2404_p12 = scmp.ne.s32.totalorder %s3225_s5, %s2403_s18  ;;  %s82_s13 = int_to_ptr.vmem [resolvable:$true] %s81_s13 }
  0x58   :  { %p2407_p13 = scmp.lt.u32.totalorder %s2403_s18, %s3225_s5 }
  0x5a   :  { %p2409_p0 = pnand %p2407_p13, %p2404_p12 }
  0x5c   :  { %2412 = shalt.err (!%p2409_p0)
}
  0x5d   :  { %s2413_s22 = scalar_lea.vmem %s82_s13, 512  ;;  %p2418_p2 = scmp.lt.s32.totalorder %s82_s13, %s82_s13 }
  0x5e   :  { %p2414_p1 = scmp.ne.s32.totalorder %s82_s13, %s2413_s22  ;;  %p2419_p3 = scmp.lt.s32.totalorder %s2413_s22, %s2413_s22 }
  0x60   :  { %p2420_p4 = por %p2419_p3, %p2418_p2 }
  0x62   :  { %p2421_p5 = pnand %p2420_p4, %p2414_p1 }
  0x64   :  { %2424 = shalt.err (!%p2421_p5)
}
  0x65   :  { %87 = dma.hbm_to_vmem [thread:$0]  %s3225_s5, 512, %s82_s13, [#allocation12], %s2458_s7, %s2458_s7, %s2459_s8  }
  0x66   :  { %2447 = dma.done.wait [#allocation3], 256  }
  0x67   :  { %2448 = vsyncadd [#allocation3], 4294967040 }
  0x68   :  { %2449 = dma.done.wait [#allocation6], 1536  }
  0x69   :  { %2450 = vsyncadd [#allocation6], 4294965760 }
  0x6a   :  { %2451 = dma.done.wait [#allocation9], 1024  }
  0x6b   :  { %2452 = vsyncadd [#allocation9], 4294966272 }
  0x6c   :  { %2453 = dma.done.wait [#allocation12], 512  }
  0x6d   :  { %2454 = vsyncadd [#allocation12], 4294966784  ;;  %v2467_v0 = vmov 0   ;;  %v2151_v1 = vld [vmem:[#allocation5 + $0x4] ss:$8 sps:$4 sm:$0xff]   ;;  %v2163_v9 = vld [vmem:[#allocation2] sm:$0xff]  }
  0x6e   :  { %208 = vmatprep.mubr.bf16.mxu0 %v2467_v0  ;;  %v2153_v2 = vld [vmem:[#allocation5] ss:$8 sps:$4 sm:$0xff]   ;;  %176 = vmatprep.subr.bf16.mxu0 %v2151_v1  ;;  %v2154_v3 = vld [vmem:[#allocation5 + $0x14] ss:$8 sps:$4 sm:$0xff]   ;;  %v2156_v4 = vld [vmem:[#allocation5 + $0x10] ss:$8 sps:$4 sm:$0xff]  }
  0x6f   :  { %177 = vmatpush1.bf16.msra.mxu0 %v2153_v2  ;;  %v2157_v5 = vld [vmem:[#allocation5 + $0x24] ss:$8 sps:$4 sm:$0xff]   ;;  %v2159_v6 = vld [vmem:[#allocation5 + $0x20] ss:$8 sps:$4 sm:$0xff]   ;;  %v2160_v7 = vld [vmem:[#allocation5 + $0x34] ss:$8 sps:$4 sm:$0xff]  }
  0x70   :  { %178 = vmatprep.subr.bf16.mxu0 %v2154_v3  ;;  %v2162_v8 = vld [vmem:[#allocation5 + $0x30] ss:$8 sps:$4 sm:$0xff]   ;;  %vm169_vm0 = vcmask 523264   ;;  %s2468_s5 = smov 1   ;;  %s2469_s23 = smov 127   ;;  %v265_v21 = vld [vmem:[#allocation8] sm:$0xff] }
  0x71   :  { %v2164_v10 = vld [vmem:[#allocation2 + $0x8] sm:$0xff]   ;;  %v257_v22 = vld [vmem:[#allocation7] sm:$0xff]  ;;  %v258_v26 = vld [vmem:[#allocation7 + $0x8] sm:$0xff]  ;;  %vm375_vm1 = vcmask 64512   ;;  %s2470_s0 = smov 120   ;;  %s2471_s14 = smov 112  }
  0x72   :  { %v266_v27 = vld [vmem:[#allocation8 + $0x8] sm:$0xff]  ;;  %v277_v29 = vld [vmem:[#allocation10] sm:$0xff]  ;;  %v267_v39 = vld [vmem:[#allocation8 + $0x10] sm:$0xff]  ;;  %s2472_s24 = smov 96   ;;  %s2473_s25 = smov 104   ;;  %vm892_vm2 = vcmask 261120  }
  0x73   :  { %179 = vmatpush1.bf16.msra.mxu0 %v2156_v4  ;;  %v278_v30 = vld [vmem:[#allocation10 + $0x8] sm:$0xff]  ;;  %v268_v41 = vld [vmem:[#allocation8 + $0x18] sm:$0xff]  ;;  %v259_v44 = vld [vmem:[#allocation7 + $0x10] sm:$0xff]  ;;  %s2474_s26 = smov 80   ;;  %s2475_s27 = smov 88   ;;  %vm1721_vm3 = vcmask 130112  }
  0x74   :  { %180 = vmatprep.subr.bf16.mxu0 %v2157_v5  ;;  %v260_v45 = vld [vmem:[#allocation7 + $0x18] sm:$0xff]  ;;  %v279_v47 = vld [vmem:[#allocation10 + $0x10] sm:$0xff]  ;;  %s2476_s28 = smov 72   ;;  %s2478_s29 = smov 24   ;;  %vm1742_vm4 = vcmask 195712   ;;  %vm1763_vm5 = vcmask 261312  }
  0x75   :  { %v280_v52 = vld [vmem:[#allocation10 + $0x18] sm:$0xff]  ;;  %s2479_s30 = smov 32   ;;  %s2480_s9 = smov 40   ;;  %vm1784_vm6 = vcmask 326912   ;;  %vm1805_vm7 = vcmask 392512   ;;  %vm1826_vm8 = vcmask 458112  }
  0x76   :  { %s2481_s10 = smov 48   ;;  %s2482_s2 = smov 56   ;;  %vm1847_vm9 = vcmask 523712  }
  0x77   :  { %181 = vmatpush1.bf16.msra.mxu0 %v2159_v6  ;;  %s2483_s11 = smov [#allocation13]  }
  0x78   :  { %182 = vmatprep.subr.bf16.mxu0 %v2160_v7  ;;  %s1857_s12 = sshll.u32 %s2483_s11, 4  ;;  %s1858_s12 = int_to_ptr.vmem [resolvable:$true] %s1857_s12 }
  0x79   :  { %s2425_s13 = scalar_lea.vmem %s1858_s12, 512  ;;  %p2430_p7 = scmp.lt.s32.totalorder %s1858_s12, %s1858_s12 }
  0x7a   :  { %p2426_p6 = scmp.ne.s32.totalorder %s1858_s12, %s2425_s13  ;;  %p2431_p8 = scmp.lt.s32.totalorder %s2425_s13, %s2425_s13 }
  0x7b   :  { %183 = vmatpush1.bf16.msra.mxu0 %v2162_v8 }
  0x7c   :  { %p2432_p9 = por %p2431_p8, %p2430_p7 }
  0x7e   :  { %1882 = vmatmul.mubr.msk.bf16.vlgmr.msra.gmra.mrb[0].mxu0 %vm169_vm0, %v2163_v9  ;;  %p2433_p10 = pnand %p2432_p9, %p2426_p6 }
  0x7f   :  { %218 = vmatprep.mubr.bf16.mxu0 %v2467_v0 }
  0x86   :  { %1883 = vmatmul.mubr.msk.bf16.gmra.mrb[4].mxu0 %vm169_vm0, %v2164_v10 }
 0x151   :  { %v210_v11 = vpop.f32.mrb[0].mxu0 }
 0x152   :  { %245 = vrot.lane.b32.xlu1 %v210_v11, %s2468_s5  ;;  %233 = vrot.lane.b32.xlu0 %v210_v11, %s2469_s23  ;;  %v212_v12 = vpop.f32.mrb[1].mxu0  ;;  %v261_v28 = vmul.f32 %v257_v22, %v210_v11 }
 0x153   :  { %v214_v13 = vpop.f32.mrb[2].mxu0 }
 0x154   :  { %v216_v14 = vpop.f32.mrb[3].mxu0  ;;  %v262_v33 = vmul.f32 %v258_v26, %v214_v13 }
 0x155   :  { %v2608_v15 = vpack.c.bf16 %v216_v14, %v212_v12 }
 0x156   :  { %247 = vrot.lane.b32.xlu1 %v214_v13, %s2468_s5  ;;  %235 = vrot.lane.b32.xlu0 %v214_v13, %s2469_s23 }
 0x159   :  { %v220_v16 = vpop.f32.mrb[4].mxu0 }
 0x15a   :  { %237 = vrot.lane.b32.xlu0 %v220_v16, %s2469_s23  ;;  %v222_v17 = vpop.f32.mrb[5].mxu0  ;;  %v263_v53 = vmul.f32 %v259_v44, %v220_v16 }
 0x15b   :  { %v224_v18 = vpop.f32.mrb[6].mxu0 }
 0x15c   :  { %239 = vrot.lane.b32.xlu1 %v224_v18, %s2469_s23  ;;  %v226_v19 = vpop.f32.mrb[7].mxu0  ;;  %v264_v54 = vmul.f32 %v260_v45, %v224_v18 }
 0x15d   :  { %v2610_v20 = vpack.c.bf16 %v226_v19, %v222_v17 }
 0x15e   :  { %249 = vrot.lane.b32.xlu0 %v220_v16, %s2468_s5 }
 0x160   :  { %251 = vrot.lane.b32.xlu1 %v224_v18, %s2468_s5 }
 0x1c4   :  { %v246_v23 = vpop.permute.xlu1 %245  ;;  %v234_v24 = vpop.permute.xlu0 %233 }
 0x1c5   :  { %v269_v25 = vmul.f32 %v265_v21, %v234_v24  ;;  %v281_v36 = vmul.f32 %v277_v29, %v246_v23 }
 0x1c7   :  { %v273_v34 = vadd.f32 %v269_v25, %v261_v28 }
 0x1c8   :  { %v248_v31 = vpop.permute.xlu1 %247  ;;  %v236_v32 = vpop.permute.xlu0 %235 }
 0x1c9   :  { %v270_v35 = vmul.f32 %v266_v27, %v236_v32  ;;  %v282_v37 = vmul.f32 %v278_v30, %v248_v31  ;;  %v285_v42 = vadd.f32 %v281_v36, %v273_v34 }
 0x1cb   :  { %v274_v38 = vadd.f32 %v270_v35, %v262_v33 }
 0x1cc   :  { %v238_v40 = vpop.permute.xlu0 %237 }
 0x1cd   :  { %v286_v43 = vadd.f32 %v282_v37, %v274_v38  ;;  %v271_v49 = vmul.f32 %v267_v39, %v238_v40 }
 0x1ce   :  { %v240_v46 = vpop.permute.xlu1 %239 }
 0x1cf   :  { %v289_v48 = vpack.c.bf16 %v286_v43, %v285_v42  ;;  %v272_v50 = vmul.f32 %v268_v41, %v240_v46  ;;  %v275_v57 = vadd.f32 %v271_v49, %v263_v53  ;;  %v2783_v53 = vld [vmem:[#allocation11 + $0x10] sm:$0xff] }
 0x1d0   :  { %v250_v51 = vpop.permute.xlu0 %249 }
 0x1d1   :  { %v283_v55 = vmul.f32 %v279_v47, %v250_v51  ;;  %1984 = vmatprep.mubr.msk.bf16.mxu1 %vm375_vm1, %v289_v48  ;;  %295 = vrot.lane.b32.xlu0 %v289_v48, %s2470_s0  ;;  %v276_v58 = vadd.f32 %v272_v50, %v264_v54 }
 0x1d2   :  { %v252_v56 = vpop.permute.xlu1 %251 }
 0x1d3   :  { %v284_v59 = vmul.f32 %v280_v52, %v252_v56  ;;  %v287_v60 = vadd.f32 %v283_v55, %v275_v57  ;;  %v2785_v55 = vld [vmem:[#allocation11] sm:$0xff] }
 0x1d5   :  { %v288_v61 = vadd.f32 %v284_v59, %v276_v58  ;;  %299 = vrot.lane.b32.xlu0 %v289_v48, %s2471_s14  ;;  %v2790_v58 = vld [vmem:[#allocation11 + $0x8] sm:$0xff] }
 0x1d7   :  { %v2615_v62 = vpack.c.bf16 %v288_v61, %v287_v60 }
 0x1d9   :  { %301 = vrot.lane.b32.xlu0 %v2615_v62, %s2471_s14  ;;  %297 = vrot.lane.b32.xlu1 %v2615_v62, %s2470_s0 }
 0x1dd   :  { %307 = vrot.lane.b32.xlu0 %v289_v48, %s2472_s24  ;;  %303 = vrot.lane.b32.xlu1 %v289_v48, %s2473_s25 }
 0x1e1   :  { %309 = vrot.lane.b32.xlu0 %v2615_v62, %s2472_s24  ;;  %305 = vrot.lane.b32.xlu1 %v2615_v62, %s2473_s25 }
 0x1e5   :  { %315 = vrot.lane.b32.xlu0 %v289_v48, %s2474_s26  ;;  %311 = vrot.lane.b32.xlu1 %v289_v48, %s2475_s27 }
 0x1e9   :  { %317 = vrot.lane.b32.xlu0 %v2615_v62, %s2474_s26  ;;  %313 = vrot.lane.b32.xlu1 %v2615_v62, %s2475_s27 }
 0x1ed   :  { %371 = vrot.lane.b32.xlu0 %v289_v48, %s2462_s3  ;;  %319 = vrot.lane.b32.xlu1 %v289_v48, %s2476_s28 }
 0x1f1   :  { %373 = vrot.lane.b32.xlu0 %v2615_v62, %s2462_s3  ;;  %321 = vrot.lane.b32.xlu1 %v2615_v62, %s2476_s28 }
 0x243   :  { %v296_v63 = vpop.permute.xlu0 %295 }
 0x244   :  { %1992 = vmatprep.mubr.msk.bf16.mxu0 %vm375_vm1, %v296_v63  ;;  %437 = vrot.lane.b32.xlu1 %v296_v63, %s2462_s3  ;;  %v2797_v63 = vld [vmem:[#allocation11 + $0x18] sm:$0xff] }
 0x247   :  { %v300_v0 = vpop.permute.xlu0 %299 }
 0x248   :  { %502 = vrot.lane.b32.xlu0 %v300_v0, %s2462_s3 }
 0x24b   :  { %v2642_v1 = vpop.permute.xlu0 %301  ;;  %v2644_v2 = vpop.permute.xlu1 %297 }
 0x24c   :  { %504 = vrot.lane.b32.xlu0 %v2642_v1, %s2462_s3  ;;  %439 = vrot.lane.b32.xlu1 %v2644_v2, %s2462_s3 }
 0x24f   :  { %v2650_v3 = vpop.permute.xlu0 %307  ;;  %v2652_v4 = vpop.permute.xlu1 %303 }
 0x250   :  { %632 = vrot.lane.b32.xlu0 %v2650_v3, %s2462_s3  ;;  %567 = vrot.lane.b32.xlu1 %v2652_v4, %s2462_s3 }
 0x253   :  { %v2658_v5 = vpop.permute.xlu0 %309  ;;  %v2660_v6 = vpop.permute.xlu1 %305 }
 0x254   :  { %634 = vrot.lane.b32.xlu0 %v2658_v5, %s2462_s3  ;;  %569 = vrot.lane.b32.xlu1 %v2660_v6, %s2462_s3 }
 0x257   :  { %v2666_v7 = vpop.permute.xlu0 %315  ;;  %v2668_v8 = vpop.permute.xlu1 %311 }
 0x258   :  { %762 = vrot.lane.b32.xlu0 %v2666_v7, %s2462_s3  ;;  %697 = vrot.lane.b32.xlu1 %v2668_v8, %s2462_s3 }
 0x25b   :  { %v2674_v9 = vpop.permute.xlu0 %317  ;;  %v2676_v10 = vpop.permute.xlu1 %313 }
 0x25c   :  { %764 = vrot.lane.b32.xlu0 %v2674_v9, %s2462_s3  ;;  %699 = vrot.lane.b32.xlu1 %v2676_v10, %s2462_s3 }
 0x25f   :  { %v372_v11 = vpop.permute.xlu0 %371  ;;  %v2682_v12 = vpop.permute.xlu1 %319 }
 0x260   :  { %2108 = vmatprep.subr.msk.bf16.mxu1 %vm375_vm1, %v372_v11  ;;  %827 = vrot.lane.b32.xlu1 %v2682_v12, %s2462_s3  ;;  %v383_v13 = vsel %vm375_vm1, %v372_v11, 0 }
 0x261   :  { %327 = vrot.lane.b32.xlu0 %v2610_v20, %s2470_s0  ;;  %1981 = vmatpush3.bf16.xpose.msra.mxu1 %v383_v13 }
 0x263   :  { %v374_v14 = vpop.permute.xlu0 %373  ;;  %v2690_v16 = vpop.permute.xlu1 %321 }
 0x264   :  { %2109 = vmatprep.subr.msk.bf16.mxu1 %vm375_vm1, %v374_v14  ;;  %829 = vrot.lane.b32.xlu1 %v2690_v16, %s2462_s3  ;;  %v386_v17 = vsel %vm375_vm1, %v374_v14, 0  ;;  %s2477_s3 = smov 16  }
 0x265   :  { %331 = vrot.lane.b32.xlu0 %v2608_v15, %s2471_s14 }
 0x268   :  { %325 = vrot.lane.b32.xlu1 %v2608_v15, %s2470_s0 }
 0x269   :  { %333 = vrot.lane.b32.xlu0 %v2610_v20, %s2471_s14  ;;  %1983 = vmatpush3.bf16.xpose.msra.mxu1 %v386_v17 }
 0x26c   :  { %337 = vrot.lane.b32.xlu1 %v2608_v15, %s2473_s25 }
 0x26d   :  { %339 = vrot.lane.b32.xlu0 %v2610_v20, %s2473_s25 }
 0x270   :  { %1985 = vmatmul.mubr.msk.bf16.vlgmr.msra.gmra.mrb[0].mxu1 %vm375_vm1, %v2615_v62  ;;  %345 = vrot.lane.b32.xlu1 %v2610_v20, %s2472_s24 }
 0x271   :  { %343 = vrot.lane.b32.xlu0 %v2608_v15, %s2472_s24  ;;  %2000 = vmatprep.mubr.msk.bf16.mxu1 %vm375_vm1, %v300_v0 }
 0x275   :  { %349 = vrot.lane.b32.xlu0 %v2608_v15, %s2475_s27 }
 0x279   :  { %351 = vrot.lane.b32.xlu0 %v2610_v20, %s2475_s27 }
 0x2b6   :  { %v438_v18 = vpop.permute.xlu1 %437 }
 0x2b7   :  { %2110 = vmatprep.subr.msk.bf16.mxu0 %vm375_vm1, %v438_v18  ;;  %v448_v19 = vsel %vm375_vm1, %v438_v18, 0 }
 0x2b8   :  { %1989 = vmatpush3.bf16.xpose.msra.mxu0 %v448_v19 }
 0x2ba   :  { %v503_v21 = vpop.permute.xlu0 %502 }
 0x2bb   :  { %2112 = vmatprep.subr.msk.bf16.mxu1 %vm375_vm1, %v503_v21  ;;  %v513_v22 = vsel %vm375_vm1, %v503_v21, 0 }
 0x2bc   :  { %1997 = vmatpush3.bf16.xpose.msra.mxu1 %v513_v22 }
 0x2be   :  { %v505_v23 = vpop.permute.xlu0 %504  ;;  %v440_v24 = vpop.permute.xlu1 %439 }
 0x2bf   :  { %2111 = vmatprep.subr.msk.bf16.mxu0 %vm375_vm1, %v440_v24  ;;  %2113 = vmatprep.subr.msk.bf16.mxu1 %vm375_vm1, %v505_v23  ;;  %v451_v25 = vsel %vm375_vm1, %v440_v24, 0  ;;  %v516_v27 = vsel %vm375_vm1, %v505_v23, 0 }
 0x2c0   :  { %1991 = vmatpush3.bf16.xpose.msra.mxu0 %v451_v25 }
 0x2c2   :  { %v568_v26 = vpop.permute.xlu1 %567  ;;  %v633_v28 = vpop.permute.xlu0 %632 }
 0x2c3   :  { %2114 = vmatprep.subr.msk.bf16.mxu0 %vm375_vm1, %v568_v26  ;;  %v578_v29 = vsel %vm375_vm1, %v568_v26, 0  ;;  %v643_v31 = vsel %vm375_vm1, %v633_v28, 0 }
 0x2c4   :  { %1999 = vmatpush3.bf16.xpose.msra.mxu1 %v516_v27 }
 0x2c5   :  { %2116 = vmatprep.subr.msk.bf16.mxu1 %vm375_vm1, %v633_v28 }
 0x2c6   :  { %v570_v30 = vpop.permute.xlu1 %569  ;;  %v635_v32 = vpop.permute.xlu0 %634 }
 0x2c7   :  { %1993 = vmatmul.mubr.msk.bf16.vlgmr.msra.gmra.mrb[8].mxu0 %vm375_vm1, %v2644_v2  ;;  %v581_v33 = vsel %vm375_vm1, %v570_v30, 0  ;;  %v646_v35 = vsel %vm375_vm1, %v635_v32, 0 }
 0x2c8   :  { %2005 = vmatpush3.bf16.xpose.msra.mxu0 %v578_v29  ;;  %2008 = vmatprep.mubr.msk.bf16.mxu0 %vm375_vm1, %v2652_v4 }
 0x2c9   :  { %2115 = vmatprep.subr.msk.bf16.mxu0 %vm375_vm1, %v570_v30 }
 0x2ca   :  { %v698_v34 = vpop.permute.xlu1 %697  ;;  %v763_v36 = vpop.permute.xlu0 %762 }
 0x2cb   :  { %2001 = vmatmul.mubr.msk.bf16.vlgmr.msra.gmra.mrb[4].mxu1 %vm375_vm1, %v2642_v1  ;;  %v708_v37 = vsel %vm375_vm1, %v698_v34, 0  ;;  %v773_v39 = vsel %vm375_vm1, %v763_v36, 0 }
 0x2cc   :  { %2013 = vmatpush3.bf16.xpose.msra.mxu1 %v643_v31  ;;  %2016 = vmatprep.mubr.msk.bf16.mxu1 %vm375_vm1, %v2650_v3 }
 0x2cd   :  { %2117 = vmatprep.subr.msk.bf16.mxu1 %vm375_vm1, %v635_v32 }
 0x2ce   :  { %v700_v38 = vpop.permute.xlu1 %699  ;;  %v765_v40 = vpop.permute.xlu0 %764 }
 0x2cf   :  { %v711_v41 = vsel %vm375_vm1, %v700_v38, 0  ;;  %v776_v43 = vsel %vm375_vm1, %v765_v40, 0 }
 0x2d0   :  { %2007 = vmatpush3.bf16.xpose.msra.mxu0 %v581_v33 }
 0x2d1   :  { %2118 = vmatprep.subr.msk.bf16.mxu0 %vm375_vm1, %v698_v34 }
 0x2d2   :  { %v828_v42 = vpop.permute.xlu1 %827 }
 0x2d3   :  { %v2758_v44 = vpop.permute.xlu0 %327  ;;  %v838_v45 = vsel %vm375_vm1, %v828_v42, 0 }
 0x2d4   :  { %2015 = vmatpush3.bf16.xpose.msra.mxu1 %v646_v35 }
 0x2d5   :  { %2120 = vmatprep.subr.msk.bf16.mxu1 %vm375_vm1, %v763_v36 }
 0x2d6   :  { %v830_v46 = vpop.permute.xlu1 %829 }
 0x2d7   :  { %2009 = vmatmul.mubr.msk.bf16.vlgmr.msra.gmra.mrb[12].mxu0 %vm375_vm1, %v2660_v6  ;;  %v332_v47 = vpop.permute.xlu0 %331  ;;  %v841_v48 = vsel %vm375_vm1, %v830_v46, 0 }
 0x2d8   :  { %2021 = vmatpush3.bf16.xpose.msra.mxu0 %v708_v37  ;;  %2024 = vmatprep.mubr.msk.bf16.mxu0 %vm375_vm1, %v2668_v8 }
 0x2d9   :  { %2119 = vmatprep.subr.msk.bf16.mxu0 %vm375_vm1, %v700_v38 }
 0x2da   :  { %v2772_v49 = vpop.permute.xlu1 %325 }
 0x2db   :  { %2017 = vmatmul.mubr.msk.bf16.vlgmr.msra.gmra.mrb[8].mxu1 %vm375_vm1, %v2658_v5  ;;  %v334_v50 = vpop.permute.xlu0 %333 }
 0x2dc   :  { %2029 = vmatpush3.bf16.xpose.msra.mxu1 %v773_v39  ;;  %2032 = vmatprep.mubr.msk.bf16.mxu1 %vm375_vm1, %v2666_v7 }
 0x2dd   :  { %2121 = vmatprep.subr.msk.bf16.mxu1 %vm375_vm1, %v765_v40 }
 0x2df   :  { %v2776_v51 = vpop.permute.xlu0 %339 }
 0x2e0   :  { %2023 = vmatpush3.bf16.xpose.msra.mxu0 %v711_v41 }
 0x2e1   :  { %2122 = vmatprep.subr.msk.bf16.mxu0 %vm375_vm1, %v828_v42 }
 0x2e3   :  { %v2780_v52 = vpop.permute.xlu0 %343 }
 0x2e4   :  { %2031 = vmatpush3.bf16.xpose.msra.mxu1 %v776_v43 }
 0x2e5   :  { %2044 = vmatprep.subr.bf16.mxu1 %v2608_v15 }
 0x2e7   :  { %2025 = vmatmul.mubr.msk.bf16.vlgmr.msra.gmra.mrb[16].mxu0 %vm375_vm1, %v2676_v10 }
 0x2e8   :  { %2037 = vmatpush3.bf16.xpose.msra.mxu0 %v838_v45  ;;  %2040 = vmatprep.mubr.msk.bf16.mxu0 %vm375_vm1, %v2682_v12 }
 0x2e9   :  { %2123 = vmatprep.subr.msk.bf16.mxu0 %vm375_vm1, %v830_v46 }
 0x2eb   :  { %2033 = vmatmul.mubr.msk.bf16.vlgmr.msra.gmra.mrb[12].mxu1 %vm375_vm1, %v2674_v9 }
 0x2ec   :  { %2045 = vmatpush3.bf16.msra.mxu1 %v2608_v15 }
 0x2ed   :  { %2046 = vmatprep.subr.bf16.mxu1 %v2610_v20 }
 0x2f0   :  { %2039 = vmatpush3.bf16.xpose.msra.mxu0 %v841_v48  ;;  %2047 = vmatpush3.bf16.msra.mxu1 %v2610_v20 }
 0x2f1   :  { %2052 = vmatprep.subr.bf16.mxu1 %v2772_v49  ;;  %2060 = vmatprep.subr.bf16.mxu0 %v332_v47 }
 0x2f7   :  { %2041 = vmatmul.mubr.msk.bf16.vlgmr.msra.gmra.mrb[20].mxu0 %vm375_vm1, %v2690_v16 }
 0x2f8   :  { %2061 = vmatpush3.bf16.msra.mxu0 %v332_v47 }
 0x2f9   :  { %2062 = vmatprep.subr.bf16.mxu0 %v334_v50 }
 0x2fc   :  { %2063 = vmatpush3.bf16.msra.mxu0 %v334_v50 }
 0x2fd   :  { %2076 = vmatprep.subr.bf16.mxu0 %v2780_v52 }
 0x343   :  { %v1986_v54 = vpop.f32.mrb[0].mxu1 }
 0x344   :  { %v2788_v56 = vadd.f32 %v1986_v54, %v2783_v53  ;;  %v422_v57 = vpop.f32.mrb[1].mxu1 }
 0x345   :  { %v1987_v59 = vpop.f32.mrb[2].mxu1  ;;  %v2793_v60 = vadd.f32 %v422_v57, %v2785_v55 }
 0x346   :  { %v425_v61 = vpop.f32.mrb[3].mxu1  ;;  %v899_v62 = vsel %vm892_vm2, %v2788_v56, -inf  ;;  %v2805_v2 = vadd.f32 %v1987_v59, %v2797_v63 }
 0x347   :  { %v2800_v0 = vadd.f32 %v425_v61, %v2790_v58  ;;  %900 = vmax.xlane.f32.xlu0 %v899_v62  ;;  %v893_v3 = vsel %vm892_vm2, %v2793_v60, -inf }
 0x348   :  { %v902_v4 = vsel %vm892_vm2, %v2805_v2, -inf }
 0x349   :  { %v896_v1 = vsel %vm892_vm2, %v2800_v0, -inf }
 0x34a   :  { %897 = vmax.xlane.f32.xlu1 %v896_v1 }
 0x34b   :  { %894 = vmax.xlane.f32.xlu0 %v893_v3 }
 0x34f   :  { %903 = vmax.xlane.f32.xlu0 %v902_v4 }
 0x39a   :  { %v1994_v5 = vpop.f32.mrb[8].mxu0 }
 0x39b   :  { %v2812_v6 = vadd.f32 %v1994_v5, %v2783_v53  ;;  %v487_v7 = vpop.f32.mrb[9].mxu0 }
 0x39c   :  { %v1995_v8 = vpop.f32.mrb[10].mxu0  ;;  %v2825_v18 = vadd.f32 %v487_v7, %v2785_v55 }
 0x39d   :  { %v2815_v9 = vadd.f32 %v1995_v8, %v2797_v63  ;;  %v490_v10 = vpop.f32.mrb[11].mxu0  ;;  %v911_v11 = vsel %vm892_vm2, %v2812_v6, -inf }
 0x39e   :  { %v2002_v12 = vpop.f32.mrb[4].mxu1  ;;  %912 = vmax.xlane.f32.xlu1 %v911_v11  ;;  %v2833_v23 = vadd.f32 %v490_v10, %v2790_v58  ;;  %v905_v26 = vsel %vm892_vm2, %v2825_v18, -inf }
 0x39f   :  { %v2820_v13 = vadd.f32 %v2002_v12, %v2783_v53  ;;  %v552_v14 = vpop.f32.mrb[5].mxu1  ;;  %v914_v16 = vsel %vm892_vm2, %v2815_v9, -inf }
 0x3a0   :  { %v2003_v17 = vpop.f32.mrb[6].mxu1  ;;  %915 = vmax.xlane.f32.xlu0 %v914_v16  ;;  %v2838_v25 = vadd.f32 %v552_v14, %v2785_v55  ;;  %v908_v28 = vsel %vm892_vm2, %v2833_v23, -inf }
 0x3a1   :  { %v2828_v19 = vadd.f32 %v2003_v17, %v2797_v63  ;;  %v555_v21 = vpop.f32.mrb[7].mxu1  ;;  %v923_v22 = vsel %vm892_vm2, %v2820_v13, -inf }
 0x3a2   :  { %924 = vmax.xlane.f32.xlu1 %v923_v22  ;;  %v2843_v27 = vadd.f32 %v555_v21, %v2790_v58  ;;  %v917_v29 = vsel %vm892_vm2, %v2838_v25, -inf }
 0x3a3   :  { %v926_v24 = vsel %vm892_vm2, %v2828_v19, -inf }
 0x3a4   :  { %927 = vmax.xlane.f32.xlu0 %v926_v24  ;;  %v920_v33 = vsel %vm892_vm2, %v2843_v27, -inf }
 0x3a6   :  { %906 = vmax.xlane.f32.xlu1 %v905_v26 }
 0x3a8   :  { %909 = vmax.xlane.f32.xlu0 %v908_v28 }
 0x3aa   :  { %v2010_v30 = vpop.f32.mrb[12].mxu0  ;;  %918 = vmax.xlane.f32.xlu1 %v917_v29 }
 0x3ab   :  { %v2850_v31 = vadd.f32 %v2010_v30, %v2783_v53  ;;  %v617_v32 = vpop.f32.mrb[13].mxu0 }
 0x3ac   :  { %v2011_v34 = vpop.f32.mrb[14].mxu0  ;;  %921 = vmax.xlane.f32.xlu0 %v920_v33  ;;  %v2865_v43 = vadd.f32 %v617_v32, %v2785_v55 }
 0x3ad   :  { %v2855_v35 = vadd.f32 %v2011_v34, %v2797_v63  ;;  %v620_v36 = vpop.f32.mrb[15].mxu0  ;;  %v935_v37 = vsel %vm892_vm2, %v2850_v31, -inf }
 0x3ae   :  { %v2018_v38 = vpop.f32.mrb[8].mxu1  ;;  %936 = vmax.xlane.f32.xlu1 %v935_v37  ;;  %v2873_v48 = vadd.f32 %v620_v36, %v2790_v58  ;;  %v929_v57 = vsel %vm892_vm2, %v2865_v43, -inf }
 0x3af   :  { %v2860_v39 = vadd.f32 %v2018_v38, %v2783_v53  ;;  %v682_v40 = vpop.f32.mrb[9].mxu1  ;;  %v938_v41 = vsel %vm892_vm2, %v2855_v35, -inf  ;;  %v2929_v38 = vpop.permute.xlu0 %349 }
 0x3b0   :  { %v2019_v42 = vpop.f32.mrb[10].mxu1  ;;  %939 = vmax.xlane.f32.xlu0 %v938_v41  ;;  %v2878_v54 = vadd.f32 %v682_v40, %v2785_v55  ;;  %v932_v61 = vsel %vm892_vm2, %v2873_v48, -inf }
 0x3b1   :  { %v2868_v45 = vadd.f32 %v2019_v42, %v2797_v63  ;;  %v685_v46 = vpop.f32.mrb[11].mxu1  ;;  %v947_v47 = vsel %vm892_vm2, %v2860_v39, -inf }
 0x3b2   :  { %948 = vmax.xlane.f32.xlu1 %v947_v47  ;;  %v2883_v59 = vadd.f32 %v685_v46, %v2790_v58  ;;  %v941_v62 = vsel %vm892_vm2, %v2878_v54, -inf }
 0x3b3   :  { %v950_v50 = vsel %vm892_vm2, %v2868_v45, -inf }
 0x3b4   :  { %951 = vmax.xlane.f32.xlu0 %v950_v50  ;;  %v944_v5 = vsel %vm892_vm2, %v2883_v59, -inf  ;;  %v2933_v50 = vpop.permute.xlu1 %337 }
 0x3b6   :  { %930 = vmax.xlane.f32.xlu1 %v929_v57  ;;  %v2935_v57 = vpop.permute.xlu0 %351 }
 0x3b8   :  { %933 = vmax.xlane.f32.xlu0 %v932_v61  ;;  %v2937_v61 = vpop.permute.xlu1 %345 }
 0x3ba   :  { %v2026_v1 = vpop.f32.mrb[16].mxu0  ;;  %942 = vmax.xlane.f32.xlu1 %v941_v62 }
 0x3bb   :  { %v2890_v3 = vadd.f32 %v2026_v1, %v2783_v53  ;;  %v747_v4 = vpop.f32.mrb[17].mxu0 }
 0x3bc   :  { %v2027_v7 = vpop.f32.mrb[18].mxu0  ;;  %945 = vmax.xlane.f32.xlu0 %v944_v5  ;;  %v2905_v22 = vadd.f32 %v747_v4, %v2785_v55 }
 0x3bd   :  { %v2895_v8 = vadd.f32 %v2027_v7, %v2797_v63  ;;  %v750_v10 = vpop.f32.mrb[19].mxu0  ;;  %v959_v11 = vsel %vm892_vm2, %v2890_v3, -inf }
 0x3be   :  { %v2034_v12 = vpop.f32.mrb[12].mxu1  ;;  %960 = vmax.xlane.f32.xlu1 %v959_v11  ;;  %v2913_v29 = vadd.f32 %v750_v10, %v2790_v58  ;;  %v953_v33 = vsel %vm892_vm2, %v2905_v22, -inf }
 0x3bf   :  { %v2900_v14 = vadd.f32 %v2034_v12, %v2783_v53  ;;  %v812_v16 = vpop.f32.mrb[13].mxu1  ;;  %v962_v17 = vsel %vm892_vm2, %v2895_v8, -inf }
 0x3c0   :  { %v2035_v21 = vpop.f32.mrb[14].mxu1  ;;  %963 = vmax.xlane.f32.xlu0 %v962_v17  ;;  %v2918_v32 = vadd.f32 %v812_v16, %v2785_v55  ;;  %v956_v36 = vsel %vm892_vm2, %v2913_v29, -inf }
 0x3c1   :  { %v2908_v24 = vadd.f32 %v2035_v21, %v2797_v63  ;;  %v815_v26 = vpop.f32.mrb[15].mxu1  ;;  %v971_v28 = vsel %vm892_vm2, %v2900_v14, -inf }
 0x3c2   :  { %972 = vmax.xlane.f32.xlu1 %v971_v28  ;;  %v2923_v34 = vadd.f32 %v815_v26, %v2790_v58  ;;  %v965_v37 = vsel %vm892_vm2, %v2918_v32, -inf }
 0x3c3   :  { %v974_v30 = vsel %vm892_vm2, %v2908_v24, -inf }
 0x3c4   :  { %975 = vmax.xlane.f32.xlu0 %v974_v30  ;;  %v968_v42 = vsel %vm892_vm2, %v2923_v34, -inf }
 0x3c6   :  { %954 = vmax.xlane.f32.xlu1 %v953_v33 }
 0x3c8   :  { %957 = vmax.xlane.f32.xlu0 %v956_v36 }
 0x3ca   :  { %v2042_v40 = vpop.f32.mrb[20].mxu0  ;;  %966 = vmax.xlane.f32.xlu1 %v965_v37 }
 0x3cb   :  { %v877_v41 = vpop.f32.mrb[21].mxu0 }
 0x3cc   :  { %v2043_v46 = vpop.f32.mrb[22].mxu0  ;;  %969 = vmax.xlane.f32.xlu0 %v968_v42  ;;  %v2957_v33 = vadd.f32 %v877_v41, %v2785_v55 }
 0x3cd   :  { %v880_v47 = vpop.f32.mrb[23].mxu0 }
 0x3ce   :  { %v2973_v41 = vadd.f32 %v880_v47, %v2790_v58 }
 0x3d4   :  { %v901_v62 = vpop.xlane.xlu0 %900 }
 0x3d5   :  { %v991_v1 = vsub.f32 %v2788_v56, %v901_v62 }
 0x3d7   :  { %v1025_v4 = vmul.f32 1.442695, %v991_v1  ;;  %v898_v5 = vpop.xlane.xlu1 %897  ;;  %v980_v1 = vsel %vm892_vm2, %v2973_v41, -inf }
 0x3d8   :  { %v895_v7 = vpop.xlane.xlu0 %894  ;;  %v990_v11 = vsub.f32 %v2800_v0, %v898_v5 }
 0x3d9   :  { %2165 = vpow2.f32 %v1025_v4  ;;  %v989_v10 = vsub.f32 %v2793_v60, %v895_v7  ;;  %v2950_v60 = vadd.f32 %v2042_v40, %v2783_v53  ;;  %v2966_v53 = vadd.f32 %v2043_v46, %v2797_v63 }
 0x3da   :  { %v1023_v21 = vmul.f32 1.442695, %v990_v11  ;;  %v977_v40 = vsel %vm892_vm2, %v2957_v33, -inf }
 0x3db   :  { %v1021_v12 = vmul.f32 1.442695, %v989_v10  ;;  %v983_v36 = vsel %vm892_vm2, %v2950_v60, -inf  ;;  %v986_v62 = vsel %vm892_vm2, %v2966_v53, -inf }
 0x3dc   :  { %v904_v16 = vpop.xlane.xlu0 %903 }
 0x3dd   :  { %2167 = vpow2.f32 %v1021_v12  ;;  %v992_v17 = vsub.f32 %v2805_v2, %v904_v16 }
 0x3df   :  { %v1027_v26 = vmul.f32 1.442695, %v992_v17 }
 0x3e1   :  { %2169 = vpow2.f32 %v1027_v26 }
 0x3e2   :  { %2171 = vpow2.f32 %v1023_v21 }
 0x3e3   :  { %v2943_v28 = vpop.eup %2165 }
 0x3e4   :  { %v1091_v56 = vsel %vm892_vm2, %v2943_v28, 0.0 }
 0x3e5   :  { %1092 = vadd.xlane.f32.xlu1 %v1091_v56 }
 0x3e7   :  { %v2947_v30 = vpop.eup %2167 }
 0x3e8   :  { %v1085_v0 = vsel %vm892_vm2, %v2947_v30, 0.0 }
 0x3e9   :  { %1086 = vadd.xlane.f32.xlu1 %v1085_v0 }
 0x3eb   :  { %v2954_v2 = vpop.eup %2169 }
 0x3ec   :  { %v1094_v37 = vsel %vm892_vm2, %v2954_v2, 0.0  ;;  %v2963_v42 = vpop.eup %2171 }
 0x3ed   :  { %984 = vmax.xlane.f32.xlu1 %v983_v36  ;;  %1095 = vadd.xlane.f32.xlu0 %v1094_v37  ;;  %v1088_v55 = vsel %vm892_vm2, %v2963_v42, 0.0 }
 0x3f1   :  { %978 = vmax.xlane.f32.xlu1 %v977_v40  ;;  %1089 = vadd.xlane.f32.xlu0 %v1088_v55 }
 0x3f5   :  { %987 = vmax.xlane.f32.xlu0 %v986_v62 }
 0x3f9   :  { %981 = vmax.xlane.f32.xlu0 %v980_v1 }
 0x402   :  { %355 = vrot.lane.b32.xlu1 %v2608_v15, %s2474_s26 }
 0x40f   :  { %361 = vrot.lane.b32.xlu0 %v2608_v15, %s2476_s28 }
 0x42b   :  { %v913_v63 = vpop.xlane.xlu1 %912 }
 0x42c   :  { %v995_v46 = vsub.f32 %v2812_v6, %v913_v63 }
 0x42d   :  { %v916_v4 = vpop.xlane.xlu0 %915 }
 0x42e   :  { %v1033_v58 = vmul.f32 1.442695, %v995_v46  ;;  %v996_v47 = vsub.f32 %v2815_v9, %v916_v4 }
 0x42f   :  { %v925_v5 = vpop.xlane.xlu1 %924 }
 0x430   :  { %2173 = vpow2.f32 %v1033_v58  ;;  %v1035_v7 = vmul.f32 1.442695, %v996_v47  ;;  %v999_v10 = vsub.f32 %v2820_v13, %v925_v5 }
 0x431   :  { %v928_v11 = vpop.xlane.xlu0 %927 }
 0x432   :  { %2175 = vpow2.f32 %v1035_v7  ;;  %v1041_v12 = vmul.f32 1.442695, %v999_v10  ;;  %v1000_v16 = vsub.f32 %v2828_v19, %v928_v11 }
 0x433   :  { %v907_v17 = vpop.xlane.xlu1 %906 }
 0x434   :  { %2177 = vpow2.f32 %v1041_v12  ;;  %v1043_v15 = vmul.f32 1.442695, %v1000_v16  ;;  %v993_v21 = vsub.f32 %v2825_v18, %v907_v17 }
 0x435   :  { %v910_v6 = vpop.xlane.xlu0 %909 }
 0x436   :  { %2179 = vpow2.f32 %v1043_v15  ;;  %v1029_v26 = vmul.f32 1.442695, %v993_v21  ;;  %v994_v9 = vsub.f32 %v2833_v23, %v910_v6 }
 0x437   :  { %v919_v56 = vpop.xlane.xlu1 %918 }
 0x438   :  { %2181 = vpow2.f32 %v1029_v26  ;;  %v1031_v0 = vmul.f32 1.442695, %v994_v9  ;;  %v997_v13 = vsub.f32 %v2838_v25, %v919_v56 }
 0x439   :  { %v922_v36 = vpop.xlane.xlu0 %921 }
 0x43a   :  { %v2990_v37 = vpop.eup %2173  ;;  %2183 = vpow2.f32 %v1031_v0  ;;  %v1037_v19 = vmul.f32 1.442695, %v997_v13  ;;  %v998_v40 = vsub.f32 %v2843_v27, %v922_v36 }
 0x43b   :  { %v937_v55 = vpop.xlane.xlu1 %936  ;;  %v1103_v18 = vsel %vm892_vm2, %v2990_v37, 0.0 }
 0x43c   :  { %v2995_v62 = vpop.eup %2175  ;;  %2185 = vpow2.f32 %v1037_v19  ;;  %v1039_v23 = vmul.f32 1.442695, %v998_v40  ;;  %v1003_v1 = vsub.f32 %v2850_v31, %v937_v55  ;;  %1104 = vadd.xlane.f32.xlu1 %v1103_v18 }
 0x43d   :  { %v940_v63 = vpop.xlane.xlu0 %939  ;;  %v1106_v25 = vsel %vm892_vm2, %v2995_v62, 0.0 }
 0x43e   :  { %v3000_v46 = vpop.eup %2177  ;;  %2187 = vpow2.f32 %v1039_v23  ;;  %v1049_v4 = vmul.f32 1.442695, %v1003_v1  ;;  %v1004_v27 = vsub.f32 %v2855_v35, %v940_v63  ;;  %1107 = vadd.xlane.f32.xlu0 %v1106_v25 }
 0x43f   :  { %v949_v58 = vpop.xlane.xlu1 %948  ;;  %v1115_v47 = vsel %vm892_vm2, %v3000_v46, 0.0 }
 0x440   :  { %v3005_v5 = vpop.eup %2179  ;;  %2189 = vpow2.f32 %v1049_v4  ;;  %v1051_v31 = vmul.f32 1.442695, %v1004_v27  ;;  %v1007_v7 = vsub.f32 %v2860_v39, %v949_v58  ;;  %1116 = vadd.xlane.f32.xlu1 %v1115_v47 }
 0x441   :  { %v952_v10 = vpop.xlane.xlu0 %951  ;;  %v1118_v11 = vsel %vm892_vm2, %v3005_v5, 0.0 }
 0x442   :  { %v3010_v12 = vpop.eup %2181  ;;  %2191 = vpow2.f32 %v1051_v31  ;;  %v1057_v35 = vmul.f32 1.442695, %v1007_v7  ;;  %v1008_v16 = vsub.f32 %v2868_v45, %v952_v10  ;;  %1119 = vadd.xlane.f32.xlu0 %v1118_v11 }
 0x443   :  { %v931_v17 = vpop.xlane.xlu1 %930  ;;  %v1097_v15 = vsel %vm892_vm2, %v3010_v12, 0.0 }
 0x444   :  { %v3015_v21 = vpop.eup %2183  ;;  %2193 = vpow2.f32 %v1057_v35  ;;  %v1059_v39 = vmul.f32 1.442695, %v1008_v16  ;;  %v1001_v6 = vsub.f32 %v2865_v43, %v931_v17  ;;  %1098 = vadd.xlane.f32.xlu1 %v1097_v15 }
 0x445   :  { %v934_v26 = vpop.xlane.xlu0 %933  ;;  %v1100_v9 = vsel %vm892_vm2, %v3015_v21, 0.0 }
 0x446   :  { %v3020_v56 = vpop.eup %2185  ;;  %2195 = vpow2.f32 %v1059_v39  ;;  %v1045_v45 = vmul.f32 1.442695, %v1001_v6  ;;  %v1002_v0 = vsub.f32 %v2873_v48, %v934_v26  ;;  %1101 = vadd.xlane.f32.xlu0 %v1100_v9 }
 0x447   :  { %v943_v13 = vpop.xlane.xlu1 %942  ;;  %v1109_v36 = vsel %vm892_vm2, %v3020_v56, 0.0 }
 0x448   :  { %v3025_v19 = vpop.eup %2187  ;;  %2197 = vpow2.f32 %v1045_v45  ;;  %v1047_v43 = vmul.f32 1.442695, %v1002_v0  ;;  %v1005_v40 = vsub.f32 %v2878_v54, %v943_v13  ;;  %1110 = vadd.xlane.f32.xlu1 %v1109_v36 }
 0x449   :  { %v946_v55 = vpop.xlane.xlu0 %945  ;;  %v1112_v18 = vsel %vm892_vm2, %v3025_v19, 0.0 }
 0x44a   :  { %v3030_v23 = vpop.eup %2189  ;;  %2199 = vpow2.f32 %v1047_v43  ;;  %v1053_v48 = vmul.f32 1.442695, %v1005_v40  ;;  %v1006_v1 = vsub.f32 %v2883_v59, %v946_v55  ;;  %1113 = vadd.xlane.f32.xlu0 %v1112_v18 }
 0x44b   :  { %v961_v63 = vpop.xlane.xlu1 %960  ;;  %v1127_v25 = vsel %vm892_vm2, %v3030_v23, 0.0 }
 0x44c   :  { %v3035_v4 = vpop.eup %2191  ;;  %2201 = vpow2.f32 %v1053_v48  ;;  %v1055_v54 = vmul.f32 1.442695, %v1006_v1  ;;  %v1011_v27 = vsub.f32 %v2890_v3, %v961_v63  ;;  %1128 = vadd.xlane.f32.xlu1 %v1127_v25 }
 0x44d   :  { %v964_v58 = vpop.xlane.xlu0 %963  ;;  %v1130_v47 = vsel %vm892_vm2, %v3035_v4, 0.0 }
 0x44e   :  { %v3040_v31 = vpop.eup %2193  ;;  %2203 = vpow2.f32 %v1055_v54  ;;  %v1065_v59 = vmul.f32 1.442695, %v1011_v27  ;;  %1131 = vadd.xlane.f32.xlu0 %v1130_v47  ;;  %v1012_v0 = vsub.f32 %v2895_v8, %v964_v58 }
 0x44f   :  { %v973_v7 = vpop.xlane.xlu1 %972  ;;  %v1139_v10 = vsel %vm892_vm2, %v3040_v31, 0.0 }
 0x450   :  { %v3044_v11 = vpop.eup %2195  ;;  %2205 = vpow2.f32 %v1065_v59  ;;  %v1015_v35 = vsub.f32 %v2900_v14, %v973_v7  ;;  %1140 = vadd.xlane.f32.xlu1 %v1139_v10  ;;  %v1067_v1 = vmul.f32 1.442695, %v1012_v0 }
 0x451   :  { %v1142_v3 = vsel %vm892_vm2, %v3044_v11, 0.0  ;;  %v976_v15 = vpop.xlane.xlu0 %975 }
 0x452   :  { %v3049_v16 = vpop.eup %2197  ;;  %v1073_v17 = vmul.f32 1.442695, %v1015_v35  ;;  %1143 = vadd.xlane.f32.xlu0 %v1142_v3  ;;  %v1016_v8 = vsub.f32 %v2908_v24, %v976_v15 }
 0x453   :  { %v955_v39 = vpop.xlane.xlu1 %954  ;;  %v1121_v6 = vsel %vm892_vm2, %v3049_v16, 0.0 }
 0x454   :  { %v3053_v26 = vpop.eup %2199  ;;  %2207 = vpow2.f32 %v1073_v17  ;;  %v1009_v9 = vsub.f32 %v2905_v22, %v955_v39  ;;  %1122 = vadd.xlane.f32.xlu1 %v1121_v6 }
 0x455   :  { %v1124_v14 = vsel %vm892_vm2, %v3053_v26, 0.0  ;;  %v958_v22 = vpop.xlane.xlu0 %957 }
 0x456   :  { %v3058_v45 = vpop.eup %2201  ;;  %v1061_v13 = vmul.f32 1.442695, %v1009_v9  ;;  %1125 = vadd.xlane.f32.xlu0 %v1124_v14  ;;  %v1010_v27 = vsub.f32 %v2913_v29, %v958_v22 }
 0x457   :  { %v967_v36 = vpop.xlane.xlu1 %966  ;;  %v1133_v43 = vsel %vm892_vm2, %v3058_v45, 0.0 }
 0x458   :  { %v3063_v40 = vpop.eup %2203  ;;  %2209 = vpow2.f32 %v1061_v13  ;;  %v1013_v55 = vsub.f32 %v2918_v32, %v967_v36  ;;  %1134 = vadd.xlane.f32.xlu1 %v1133_v43  ;;  %v1075_v32 = vmul.f32 1.442695, %v1016_v8  ;;  %v1063_v24 = vmul.f32 1.442695, %v1010_v27 }
 0x459   :  { %v1136_v18 = vsel %vm892_vm2, %v3063_v40, 0.0  ;;  %v970_v58 = vpop.xlane.xlu0 %969 }
 0x45a   :  { %v3068_v48 = vpop.eup %2205  ;;  %v1069_v63 = vmul.f32 1.442695, %v1013_v55  ;;  %1137 = vadd.xlane.f32.xlu0 %v1136_v18  ;;  %v1014_v7 = vsub.f32 %v2923_v34, %v970_v58 }
 0x45b   :  { %v1151_v25 = vsel %vm892_vm2, %v3068_v48, 0.0 }
 0x45c   :  { %2211 = vpow2.f32 %v1069_v63  ;;  %1152 = vadd.xlane.f32.xlu1 %v1151_v25  ;;  %v1071_v3 = vmul.f32 1.442695, %v1014_v7 }
 0x45d   :  { %2213 = vpow2.f32 %v1067_v1 }
 0x45e   :  { %v3073_v54 = vpop.eup %2207  ;;  %2215 = vpow2.f32 %v1075_v32 }
 0x45f   :  { %v1163_v47 = vsel %vm892_vm2, %v3073_v54, 0.0  ;;  %2217 = vpow2.f32 %v1063_v24 }
 0x460   :  { %1164 = vadd.xlane.f32.xlu0 %v1163_v47  ;;  %2219 = vpow2.f32 %v1071_v3 }
 0x462   :  { %v3078_v59 = vpop.eup %2209 }
 0x463   :  { %v1145_v10 = vsel %vm892_vm2, %v3078_v59, 0.0 }
 0x464   :  { %1146 = vadd.xlane.f32.xlu1 %v1145_v10 }
 0x466   :  { %v3083_v35 = vpop.eup %2211 }
 0x467   :  { %v1157_v29 = vsel %vm892_vm2, %v3083_v35, 0.0  ;;  %v3087_v17 = vpop.eup %2213 }
 0x468   :  { %1158 = vadd.xlane.f32.xlu0 %v1157_v29  ;;  %v1154_v15 = vsel %vm892_vm2, %v3087_v17, 0.0  ;;  %v3091_v39 = vpop.eup %2215 }
 0x469   :  { %v1166_v34 = vsel %vm892_vm2, %v3091_v39, 0.0  ;;  %v3095_v6 = vpop.eup %2217 }
 0x46a   :  { %v1148_v14 = vsel %vm892_vm2, %v3095_v6, 0.0  ;;  %v3099_v0 = vpop.eup %2219 }
 0x46b   :  { %v1160_v36 = vsel %vm892_vm2, %v3099_v0, 0.0 }
 0x46c   :  { %1155 = vadd.xlane.f32.xlu0 %v1154_v15 }
 0x470   :  { %1167 = vadd.xlane.f32.xlu0 %v1166_v34 }
 0x472   :  { %v1093_v9 = vpop.xlane.xlu1 %1092 }
 0x473   :  { %2221 = vrcp.f32 %v1093_v9 }
 0x474   :  { %1149 = vadd.xlane.f32.xlu0 %v1148_v14 }
 0x476   :  { %v1087_v13 = vpop.xlane.xlu1 %1086 }
 0x478   :  { %1161 = vadd.xlane.f32.xlu0 %v1160_v36 }
 0x47a   :  { %v985_v43 = vpop.xlane.xlu1 %984  ;;  %v1096_v55 = vpop.xlane.xlu0 %1095 }
 0x47b   :  { %v1019_v22 = vsub.f32 %v2950_v60, %v985_v43  ;;  %2223 = vrcp.f32 %v1096_v55 }
 0x47c   :  { %2225 = vrcp.f32 %v1087_v13 }
 0x47d   :  { %v1081_v18 = vmul.f32 1.442695, %v1019_v22  ;;  %v2222_v47 = vpop.eup %2221 }
 0x47e   :  { %v979_v1 = vpop.xlane.xlu1 %978  ;;  %v1090_v8 = vpop.xlane.xlu0 %1089  ;;  %v1215_v14 = vmul.f32 %v2222_v47, %v2943_v28 }
 0x47f   :  { %2227 = vpow2.f32 %v1081_v18  ;;  %v1017_v63 = vsub.f32 %v2957_v33, %v979_v1 }
 0x480   :  { %2229 = vrcp.f32 %v1090_v8 }
 0x481   :  { %v1077_v25 = vmul.f32 1.442695, %v1017_v63 }
 0x482   :  { %v988_v32 = vpop.xlane.xlu0 %987 }
 0x483   :  { %2231 = vpow2.f32 %v1077_v25  ;;  %v1020_v27 = vsub.f32 %v2966_v53, %v988_v32 }
 0x485   :  { %v1083_v58 = vmul.f32 1.442695, %v1020_v27  ;;  %v2224_v7 = vpop.eup %2223 }
 0x486   :  { %v982_v24 = vpop.xlane.xlu0 %981  ;;  %v2226_v10 = vpop.eup %2225  ;;  %v1216_v33 = vmul.f32 %v2224_v7, %v2954_v2 }
 0x487   :  { %2233 = vpow2.f32 %v1083_v58  ;;  %v1018_v60 = vsub.f32 %v2973_v41, %v982_v24  ;;  %v1213_v53 = vmul.f32 %v2226_v10, %v2947_v30 }
 0x488   :  { %v1246_v43 = vpack.c.bf16 %v1216_v33, %v1215_v14 }
 0x489   :  { %v3107_v3 = vpop.eup %2227  ;;  %v1079_v29 = vmul.f32 1.442695, %v1018_v60 }
 0x48a   :  { %v2230_v15 = vpop.eup %2229  ;;  %v1175_v34 = vsel %vm892_vm2, %v3107_v3, 0.0  ;;  %v3139_v55 = vpop.permute.xlu0 %361 }
 0x48b   :  { %2235 = vpow2.f32 %v1079_v29  ;;  %1176 = vadd.xlane.f32.xlu0 %v1175_v34  ;;  %v1214_v9 = vmul.f32 %v2230_v15, %v2963_v42 }
 0x48d   :  { %v3115_v13 = vpop.eup %2231  ;;  %v1245_v41 = vpack.c.bf16 %v1214_v9, %v1213_v53 }
 0x48e   :  { %v1169_v36 = vsel %vm892_vm2, %v3115_v13, 0.0 }
 0x48f   :  { %2048 = vmatprep.mubr.msk.bf16.mxu1 %vm892_vm2, %v1245_v41  ;;  %1170 = vadd.xlane.f32.xlu1 %v1169_v36 }
 0x490   :  { %2049 = vmatmul.mubr.msk.bf16.vlgmr.msra.gmra.mrb[16].mxu1 %vm892_vm2, %v1246_v43 }
 0x491   :  { %v3121_v2 = vpop.eup %2233  ;;  %2053 = vmatpush3.bf16.msra.mxu1 %v2772_v49  ;;  %v3137_v49 = vpop.permute.xlu1 %355 }
 0x492   :  { %2054 = vmatprep.subr.bf16.mxu1 %v2758_v44  ;;  %v1178_v28 = vsel %vm892_vm2, %v3121_v2, 0.0 }
 0x493   :  { %1179 = vadd.xlane.f32.xlu0 %v1178_v28 }
 0x495   :  { %v3127_v30 = vpop.eup %2235  ;;  %2055 = vmatpush3.bf16.msra.mxu1 %v2758_v44 }
 0x496   :  { %2068 = vmatprep.subr.bf16.mxu1 %v2933_v50  ;;  %v1172_v42 = vsel %vm892_vm2, %v3127_v30, 0.0 }
 0x497   :  { %1173 = vadd.xlane.f32.xlu0 %v1172_v42 }
 0x4a0   :  { %357 = vrot.lane.b32.xlu1 %v2610_v20, %s2474_s26 }
 0x4ad   :  { %363 = vrot.lane.b32.xlu0 %v2610_v20, %s2476_s28 }
 0x4c9   :  { %v1105_v22 = vpop.xlane.xlu1 %1104 }
 0x4cb   :  { %v1108_v18 = vpop.xlane.xlu0 %1107 }
 0x4cc   :  { %2237 = vrcp.f32 %v1108_v18 }
 0x4cd   :  { %v1117_v1 = vpop.xlane.xlu1 %1116 }
 0x4cf   :  { %v1120_v44 = vpop.xlane.xlu0 %1119 }
 0x4d1   :  { %v1099_v8 = vpop.xlane.xlu1 %1098 }
 0x4d2   :  { %2239 = vrcp.f32 %v1099_v8 }
 0x4d3   :  { %2241 = vrcp.f32 %v1105_v22  ;;  %v1102_v63 = vpop.xlane.xlu0 %1101 }
 0x4d4   :  { %2243 = vrcp.f32 %v1102_v63 }
 0x4d5   :  { %2245 = vrcp.f32 %v1120_v44  ;;  %v1111_v25 = vpop.xlane.xlu1 %1110 }
 0x4d6   :  { %2247 = vrcp.f32 %v1111_v25  ;;  %v2238_v27 = vpop.eup %2237 }
 0x4d7   :  { %2249 = vrcp.f32 %v1117_v1  ;;  %v1114_v32 = vpop.xlane.xlu0 %1113  ;;  %v1220_v10 = vmul.f32 %v2238_v27, %v2995_v62 }
 0x4d8   :  { %2251 = vrcp.f32 %v1114_v32 }
 0x4d9   :  { %v1129_v20 = vpop.xlane.xlu1 %1128 }
 0x4db   :  { %v1132_v58 = vpop.xlane.xlu0 %1131 }
 0x4dc   :  { %v2240_v47 = vpop.eup %2239  ;;  %2253 = vrcp.f32 %v1132_v58 }
 0x4dd   :  { %v2242_v24 = vpop.eup %2241  ;;  %v1141_v7 = vpop.xlane.xlu1 %1140  ;;  %v1217_v33 = vmul.f32 %v2240_v47, %v3010_v12 }
 0x4de   :  { %v2244_v60 = vpop.eup %2243  ;;  %v1219_v9 = vmul.f32 %v2242_v24, %v2990_v37 }
 0x4df   :  { %v2246_v29 = vpop.eup %2245  ;;  %v1144_v15 = vpop.xlane.xlu0 %1143  ;;  %v1218_v34 = vmul.f32 %v2244_v60, %v3015_v21 }
 0x4e0   :  { %v2248_v53 = vpop.eup %2247  ;;  %v1224_v28 = vmul.f32 %v2246_v29, %v3005_v5  ;;  %v1248_v42 = vpack.c.bf16 %v1220_v10, %v1219_v9 }
 0x4e1   :  { %v2250_v14 = vpop.eup %2249  ;;  %v1123_v41 = vpop.xlane.xlu1 %1122  ;;  %v1247_v36 = vpack.c.bf16 %v1218_v34, %v1217_v33  ;;  %v1221_v12 = vmul.f32 %v2248_v53, %v3020_v56 }
 0x4e2   :  { %v2252_v43 = vpop.eup %2251  ;;  %2255 = vrcp.f32 %v1123_v41  ;;  %v1223_v22 = vmul.f32 %v2250_v14, %v3000_v46 }
 0x4e3   :  { %2257 = vrcp.f32 %v1129_v20  ;;  %v1126_v62 = vpop.xlane.xlu0 %1125  ;;  %2056 = vmatprep.mubr.msk.bf16.mxu1 %vm892_vm2, %v1247_v36  ;;  %v1222_v21 = vmul.f32 %v2252_v43, %v3025_v19 }
 0x4e4   :  { %2259 = vrcp.f32 %v1126_v62  ;;  %2057 = vmatmul.mubr.msk.bf16.vlgmr.msra.gmra.mrb[20].mxu1 %vm892_vm2, %v1248_v42  ;;  %v1250_v18 = vpack.c.bf16 %v1224_v28, %v1223_v22 }
 0x4e5   :  { %2261 = vrcp.f32 %v1144_v15  ;;  %2069 = vmatpush3.bf16.msra.mxu1 %v2933_v50  ;;  %v1135_v37 = vpop.xlane.xlu1 %1134  ;;  %v1249_v5 = vpack.c.bf16 %v1222_v21, %v1221_v12 }
 0x4e6   :  { %2263 = vrcp.f32 %v1135_v37  ;;  %2070 = vmatprep.subr.bf16.mxu1 %v2776_v51  ;;  %v2254_v50 = vpop.eup %2253 }
 0x4e7   :  { %2265 = vrcp.f32 %v1141_v7  ;;  %2064 = vmatprep.mubr.msk.bf16.mxu0 %vm892_vm2, %v1249_v5  ;;  %v1138_v56 = vpop.xlane.xlu0 %1137  ;;  %v1228_v44 = vmul.f32 %v2254_v50, %v3035_v4 }
 0x4e8   :  { %2267 = vrcp.f32 %v1138_v56  ;;  %2065 = vmatmul.mubr.msk.bf16.vlgmr.msra.gmra.mrb[24].mxu0 %vm892_vm2, %v1250_v18 }
 0x4e9   :  { %2071 = vmatpush3.bf16.msra.mxu1 %v2776_v51  ;;  %2077 = vmatpush3.bf16.msra.mxu0 %v2780_v52 }
 0x4ea   :  { %2078 = vmatprep.subr.bf16.mxu0 %v2937_v61  ;;  %2084 = vmatprep.subr.bf16.mxu1 %v2929_v38 }
 0x4ec   :  { %v2256_v46 = vpop.eup %2255 }
 0x4ed   :  { %v2258_v19 = vpop.eup %2257  ;;  %2079 = vmatpush3.bf16.msra.mxu0 %v2937_v61  ;;  %v1225_v63 = vmul.f32 %v2256_v46, %v3049_v16  ;;  %v1165_v20 = vpop.xlane.xlu0 %1164 }
 0x4ee   :  { %v2260_v1 = vpop.eup %2259  ;;  %2092 = vmatprep.subr.bf16.mxu0 %v3137_v49  ;;  %v1227_v25 = vmul.f32 %v2258_v19, %v3030_v23 }
 0x4ef   :  { %v2262_v8 = vpop.eup %2261  ;;  %v1226_v51 = vmul.f32 %v2260_v1, %v3053_v26 }
 0x4f0   :  { %v2264_v52 = vpop.eup %2263  ;;  %v1232_v47 = vmul.f32 %v2262_v8, %v3044_v11  ;;  %v1252_v61 = vpack.c.bf16 %v1228_v44, %v1227_v25  ;;  %v1153_v11 = vpop.xlane.xlu1 %1152 }
 0x4f1   :  { %v2266_v32 = vpop.eup %2265  ;;  %v1251_v27 = vpack.c.bf16 %v1226_v51, %v1225_v63  ;;  %v1229_v4 = vmul.f32 %v2264_v52, %v3058_v45 }
 0x4f2   :  { %v2268_v58 = vpop.eup %2267  ;;  %v1231_v16 = vmul.f32 %v2266_v32, %v3040_v31 }
 0x4f3   :  { %2072 = vmatprep.mubr.msk.bf16.mxu1 %vm892_vm2, %v1251_v27  ;;  %v1230_v24 = vmul.f32 %v2268_v58, %v3063_v40 }
 0x4f4   :  { %2073 = vmatmul.mubr.msk.bf16.vlgmr.msra.gmra.mrb[24].mxu1 %vm892_vm2, %v1252_v61  ;;  %v1254_v7 = vpack.c.bf16 %v1232_v47, %v1231_v16  ;;  %v1147_v31 = vpop.xlane.xlu1 %1146 }
 0x4f5   :  { %2085 = vmatpush3.bf16.msra.mxu1 %v2929_v38  ;;  %v1159_v23 = vpop.xlane.xlu0 %1158  ;;  %v1253_v26 = vpack.c.bf16 %v1230_v24, %v1229_v4 }
 0x4f6   :  { %2086 = vmatprep.subr.bf16.mxu1 %v2935_v57 }
 0x4f7   :  { %2080 = vmatprep.mubr.msk.bf16.mxu0 %vm892_vm2, %v1253_v26 }
 0x4f8   :  { %2081 = vmatmul.mubr.msk.bf16.vlgmr.msra.gmra.mrb[28].mxu0 %vm892_vm2, %v1254_v7 }
 0x4f9   :  { %2087 = vmatpush3.bf16.msra.mxu1 %v2935_v57  ;;  %2093 = vmatpush3.bf16.msra.mxu0 %v3137_v49  ;;  %v1156_v45 = vpop.xlane.xlu0 %1155 }
 0x4fa   :  { %2100 = vmatprep.subr.bf16.mxu1 %v3139_v55  ;;  %2269 = vrcp.f32 %v1156_v45 }
 0x4fb   :  { %2271 = vrcp.f32 %v1147_v31 }
 0x4fc   :  { %2273 = vrcp.f32 %v1153_v11 }
 0x4fd   :  { %v1168_v40 = vpop.xlane.xlu0 %1167 }
 0x501   :  { %v1150_v38 = vpop.xlane.xlu0 %1149 }
 0x502   :  { %2275 = vrcp.f32 %v1150_v38 }
 0x503   :  { %2277 = vrcp.f32 %v1159_v23 }
 0x504   :  { %v2270_v10 = vpop.eup %2269 }
 0x505   :  { %v1162_v60 = vpop.xlane.xlu0 %1161  ;;  %v2272_v29 = vpop.eup %2271  ;;  %v1236_v57 = vmul.f32 %v2270_v10, %v3087_v17 }
 0x506   :  { %2279 = vrcp.f32 %v1162_v60  ;;  %v2274_v15 = vpop.eup %2273  ;;  %v1233_v49 = vmul.f32 %v2272_v29, %v3078_v59 }
 0x507   :  { %v1235_v9 = vmul.f32 %v2274_v15, %v3068_v48  ;;  %2281 = vrcp.f32 %v1168_v40 }
 0x508   :  { %2283 = vrcp.f32 %v1165_v20 }
 0x509   :  { %v1256_v36 = vpack.c.bf16 %v1236_v57, %v1235_v9 }
 0x50c   :  { %v2276_v33 = vpop.eup %2275 }
 0x50d   :  { %v1234_v34 = vmul.f32 %v2276_v33, %v3095_v6  ;;  %v2278_v53 = vpop.eup %2277 }
 0x50e   :  { %v1237_v43 = vmul.f32 %v2278_v53, %v3083_v35 }
 0x50f   :  { %v1255_v14 = vpack.c.bf16 %v1234_v34, %v1233_v49 }
 0x510   :  { %v2280_v41 = vpop.eup %2279 }
 0x511   :  { %2088 = vmatprep.mubr.msk.bf16.mxu1 %vm892_vm2, %v1255_v14  ;;  %v1238_v28 = vmul.f32 %v2280_v41, %v3099_v0  ;;  %v2282_v17 = vpop.eup %2281 }
 0x512   :  { %2089 = vmatmul.mubr.msk.bf16.vlgmr.msra.gmra.mrb[28].mxu1 %vm892_vm2, %v1256_v36  ;;  %v2284_v42 = vpop.eup %2283  ;;  %v1240_v62 = vmul.f32 %v2282_v17, %v3091_v39 }
 0x513   :  { %2101 = vmatpush3.bf16.msra.mxu1 %v3139_v55  ;;  %v1257_v59 = vpack.c.bf16 %v1238_v28, %v1237_v43  ;;  %v1239_v35 = vmul.f32 %v2284_v42, %v3073_v54 }
 0x515   :  { %2096 = vmatprep.mubr.msk.bf16.mxu0 %vm892_vm2, %v1257_v59  ;;  %v1258_v0 = vpack.c.bf16 %v1240_v62, %v1239_v35 }
 0x518   :  { %v1177_v48 = vpop.xlane.xlu0 %1176 }
 0x51c   :  { %v1171_v6 = vpop.xlane.xlu1 %1170 }
 0x520   :  { %v358_v12 = vpop.permute.xlu1 %357  ;;  %v1180_v21 = vpop.xlane.xlu0 %1179 }
 0x521   :  { %2094 = vmatprep.subr.bf16.mxu0 %v358_v12  ;;  %2285 = vrcp.f32 %v1180_v21 }
 0x522   :  { %2095 = vmatpush3.bf16.msra.mxu0 %v358_v12  ;;  %2287 = vrcp.f32 %v1171_v6 }
 0x523   :  { %2289 = vrcp.f32 %v1177_v48 }
 0x524   :  { %v1174_v55 = vpop.xlane.xlu0 %1173 }
 0x525   :  { %2291 = vrcp.f32 %v1174_v55  ;;  %2097 = vmatmul.mubr.msk.bf16.vlgmr.msra.gmra.mrb[32].mxu0 %vm892_vm2, %v1258_v0 }
 0x528   :  { %v364_v22 = vpop.permute.xlu0 %363 }
 0x529   :  { %2102 = vmatprep.subr.bf16.mxu1 %v364_v22 }
 0x52a   :  { %2103 = vmatpush3.bf16.msra.mxu1 %v364_v22 }
 0x52b   :  { %v2286_v37 = vpop.eup %2285 }
 0x52c   :  { %v2288_v5 = vpop.eup %2287  ;;  %v1244_v56 = vmul.f32 %v2286_v37, %v3121_v2 }
 0x52d   :  { %v2290_v39 = vpop.eup %2289  ;;  %v1241_v54 = vmul.f32 %v2288_v5, %v3115_v13 }
 0x52e   :  { %v1243_v46 = vmul.f32 %v2290_v39, %v3107_v3 }
 0x52f   :  { %v2292_v18 = vpop.eup %2291 }
 0x530   :  { %v1242_v50 = vmul.f32 %v2292_v18, %v3127_v30  ;;  %v1260_v1 = vpack.c.bf16 %v1244_v56, %v1243_v46 }
 0x532   :  { %v1259_v19 = vpack.c.bf16 %v1242_v50, %v1241_v54 }
 0x534   :  { %2104 = vmatprep.mubr.msk.bf16.mxu1 %vm892_vm2, %v1259_v19 }
 0x535   :  { %2105 = vmatmul.mubr.msk.bf16.vlgmr.msra.gmra.mrb[32].mxu1 %vm892_vm2, %v1260_v1 }
 0x563   :  { %v2050_v44 = vpop.f32.mrb[16].mxu1 }
 0x564   :  { %1703 = vst.msk [vmem:[#allocation13 + $0x10] sm:$0xff] %vm375_vm1, %v2050_v44  ;;  %v1301_v8 = vpop.f32.mrb[17].mxu1 }
 0x565   :  { %1701 = vst.msk [vmem:[#allocation13] sm:$0xff] %vm375_vm1, %v1301_v8  ;;  %v2051_v63 = vpop.f32.mrb[18].mxu1 }
 0x566   :  { %1704 = vst.msk [vmem:[#allocation13 + $0x18] sm:$0xff] %vm375_vm1, %v2051_v63  ;;  %v1304_v13 = vpop.f32.mrb[19].mxu1 }
 0x567   :  { %1702 = vst.msk [vmem:[#allocation13 + $0x8] sm:$0xff] %vm375_vm1, %v1304_v13 }
 0x5b7   :  { %v2058_v2 = vpop.f32.mrb[20].mxu1 }
 0x5b8   :  { %1713 = vrot.lane.b32.xlu1 %v2058_v2, %s2459_s8  ;;  %v1356_v3 = vpop.f32.mrb[21].mxu1 }
 0x5b9   :  { %v2059_v30 = vpop.f32.mrb[22].mxu1 }
 0x5ba   :  { %1715 = vrot.lane.b32.xlu0 %v2059_v30, %s2459_s8  ;;  %v1359_v51 = vpop.f32.mrb[23].mxu1 }
 0x5bb   :  { %v2066_v52 = vpop.f32.mrb[24].mxu0 }
 0x5bc   :  { %v1411_v25 = vpop.f32.mrb[25].mxu0  ;;  %1734 = vrot.lane.b32.xlu1 %v2066_v52, %s2477_s3 }
 0x5bd   :  { %v2067_v32 = vpop.f32.mrb[26].mxu0 }
 0x5be   :  { %v1414_v20 = vpop.f32.mrb[27].mxu0  ;;  %1736 = vrot.lane.b32.xlu0 %v2067_v32, %s2477_s3 }
 0x5c0   :  { %1709 = vrot.lane.b32.xlu1 %v1356_v3, %s2459_s8 }
 0x5c2   :  { %1711 = vrot.lane.b32.xlu0 %v1359_v51, %s2459_s8 }
 0x5c4   :  { %1730 = vrot.lane.b32.xlu1 %v1411_v25, %s2477_s3 }
 0x5c6   :  { %1732 = vrot.lane.b32.xlu0 %v1414_v20, %s2477_s3 }
 0x5c7   :  { %v2074_v27 = vpop.f32.mrb[24].mxu1 }
 0x5c8   :  { %1755 = vrot.lane.b32.xlu1 %v2074_v27, %s2478_s29  ;;  %v1466_v58 = vpop.f32.mrb[25].mxu1 }
 0x5c9   :  { %v2075_v47 = vpop.f32.mrb[26].mxu1 }
 0x5ca   :  { %1757 = vrot.lane.b32.xlu0 %v2075_v47, %s2478_s29  ;;  %v1469_v61 = vpop.f32.mrb[27].mxu1 }
 0x5cb   :  { %v2082_v4 = vpop.f32.mrb[28].mxu0 }
 0x5cc   :  { %v1521_v24 = vpop.f32.mrb[29].mxu0  ;;  %1776 = vrot.lane.b32.xlu1 %v2082_v4, %s2479_s30 }
 0x5cd   :  { %v2083_v16 = vpop.f32.mrb[30].mxu0 }
 0x5ce   :  { %v1524_v23 = vpop.f32.mrb[31].mxu0  ;;  %1778 = vrot.lane.b32.xlu0 %v2083_v16, %s2479_s30 }
 0x5d0   :  { %1751 = vrot.lane.b32.xlu1 %v1466_v58, %s2478_s29 }
 0x5d2   :  { %1753 = vrot.lane.b32.xlu0 %v1469_v61, %s2478_s29 }
 0x5d4   :  { %1772 = vrot.lane.b32.xlu1 %v1521_v24, %s2479_s30 }
 0x5d6   :  { %1774 = vrot.lane.b32.xlu0 %v1524_v23, %s2479_s30 }
 0x5e5   :  { %v2090_v26 = vpop.f32.mrb[28].mxu1 }
 0x5e6   :  { %1797 = vrot.lane.b32.xlu1 %v2090_v26, %s2480_s9  ;;  %v1576_v7 = vpop.f32.mrb[29].mxu1 }
 0x5e7   :  { %v2091_v11 = vpop.f32.mrb[30].mxu1 }
 0x5e8   :  { %1799 = vrot.lane.b32.xlu0 %v2091_v11, %s2480_s9  ;;  %v1579_v45 = vpop.f32.mrb[31].mxu1 }
 0x5f8   :  { %v2098_v31 = vpop.f32.mrb[32].mxu0 }
 0x5f9   :  { %v1631_v40 = vpop.f32.mrb[33].mxu0  ;;  %1818 = vrot.lane.b32.xlu1 %v2098_v31, %s2481_s10 }
 0x5fa   :  { %v2099_v38 = vpop.f32.mrb[34].mxu0 }
 0x5fb   :  { %v1634_v60 = vpop.f32.mrb[35].mxu0  ;;  %1820 = vrot.lane.b32.xlu0 %v2099_v38, %s2481_s10 }
 0x5fd   :  { %1793 = vrot.lane.b32.xlu1 %v1576_v7, %s2480_s9 }
 0x5ff   :  { %1795 = vrot.lane.b32.xlu0 %v1579_v45, %s2480_s9 }
 0x601   :  { %1814 = vrot.lane.b32.xlu1 %v1631_v40, %s2481_s10 }
 0x603   :  { %1816 = vrot.lane.b32.xlu0 %v1634_v60, %s2481_s10 }
 0x608   :  { %v2106_v10 = vpop.f32.mrb[32].mxu1 }
 0x609   :  { %v1686_v29 = vpop.f32.mrb[33].mxu1 }
 0x60a   :  { %1835 = vrot.lane.b32.xlu1 %v1686_v29, %s2482_s2  ;;  %v2107_v15 = vpop.f32.mrb[34].mxu1 }
 0x60b   :  { %v1689_v33 = vpop.f32.mrb[35].mxu1 }
 0x60c   :  { %1837 = vrot.lane.b32.xlu0 %v1689_v33, %s2482_s2 }
 0x60e   :  { %1839 = vrot.lane.b32.xlu1 %v2106_v10, %s2482_s2 }
 0x610   :  { %1841 = vrot.lane.b32.xlu0 %v2107_v15, %s2482_s2 }
 0x62a   :  { %v1714_v57 = vpop.permute.xlu1 %1713 }
 0x62b   :  { %1724 = vst.msk [vmem:[#allocation13 + $0x10] sm:$0xff] %vm1721_vm3, %v1714_v57 }
 0x62c   :  { %v1716_v49 = vpop.permute.xlu0 %1715 }
 0x62d   :  { %1725 = vst.msk [vmem:[#allocation13 + $0x18] sm:$0xff] %vm1721_vm3, %v1716_v49 }
 0x62e   :  { %v1735_v34 = vpop.permute.xlu1 %1734 }
 0x62f   :  { %1745 = vst.msk [vmem:[#allocation13 + $0x10] sm:$0xff] %vm1742_vm4, %v1735_v34 }
 0x630   :  { %v1737_v53 = vpop.permute.xlu0 %1736 }
 0x631   :  { %1746 = vst.msk [vmem:[#allocation13 + $0x18] sm:$0xff] %vm1742_vm4, %v1737_v53 }
 0x632   :  { %v1710_v9 = vpop.permute.xlu1 %1709 }
 0x633   :  { %1722 = vst.msk [vmem:[#allocation13] sm:$0xff] %vm1721_vm3, %v1710_v9 }
 0x634   :  { %v1712_v14 = vpop.permute.xlu0 %1711 }
 0x635   :  { %1723 = vst.msk [vmem:[#allocation13 + $0x8] sm:$0xff] %vm1721_vm3, %v1712_v14 }
 0x636   :  { %v1731_v41 = vpop.permute.xlu1 %1730 }
 0x637   :  { %1743 = vst.msk [vmem:[#allocation13] sm:$0xff] %vm1742_vm4, %v1731_v41 }
 0x638   :  { %v1733_v36 = vpop.permute.xlu0 %1732 }
 0x639   :  { %1744 = vst.msk [vmem:[#allocation13 + $0x8] sm:$0xff] %vm1742_vm4, %v1733_v36 }
 0x63a   :  { %v1756_v43 = vpop.permute.xlu1 %1755 }
 0x63b   :  { %1766 = vst.msk [vmem:[#allocation13 + $0x10] sm:$0xff] %vm1763_vm5, %v1756_v43 }
 0x63c   :  { %v1758_v28 = vpop.permute.xlu0 %1757 }
 0x63d   :  { %1767 = vst.msk [vmem:[#allocation13 + $0x18] sm:$0xff] %vm1763_vm5, %v1758_v28 }
 0x63e   :  { %v1777_v59 = vpop.permute.xlu1 %1776 }
 0x63f   :  { %1787 = vst.msk [vmem:[#allocation13 + $0x10] sm:$0xff] %vm1784_vm6, %v1777_v59 }
 0x640   :  { %v1779_v17 = vpop.permute.xlu0 %1778 }
 0x641   :  { %1788 = vst.msk [vmem:[#allocation13 + $0x18] sm:$0xff] %vm1784_vm6, %v1779_v17 }
 0x642   :  { %v1752_v48 = vpop.permute.xlu1 %1751 }
 0x643   :  { %1764 = vst.msk [vmem:[#allocation13] sm:$0xff] %vm1763_vm5, %v1752_v48 }
 0x644   :  { %v1754_v6 = vpop.permute.xlu0 %1753 }
 0x645   :  { %1765 = vst.msk [vmem:[#allocation13 + $0x8] sm:$0xff] %vm1763_vm5, %v1754_v6 }
 0x646   :  { %v1773_v42 = vpop.permute.xlu1 %1772 }
 0x647   :  { %1785 = vst.msk [vmem:[#allocation13] sm:$0xff] %vm1784_vm6, %v1773_v42 }
 0x648   :  { %v1775_v62 = vpop.permute.xlu0 %1774 }
 0x649   :  { %1786 = vst.msk [vmem:[#allocation13 + $0x8] sm:$0xff] %vm1784_vm6, %v1775_v62 }
 0x658   :  { %v1798_v12 = vpop.permute.xlu1 %1797 }
 0x659   :  { %1808 = vst.msk [vmem:[#allocation13 + $0x10] sm:$0xff] %vm1805_vm7, %v1798_v12 }
 0x65a   :  { %v1800_v21 = vpop.permute.xlu0 %1799 }
 0x65b   :  { %1809 = vst.msk [vmem:[#allocation13 + $0x18] sm:$0xff] %vm1805_vm7, %v1800_v21 }
 0x66b   :  { %v1819_v35 = vpop.permute.xlu1 %1818 }
 0x66c   :  { %1829 = vst.msk [vmem:[#allocation13 + $0x10] sm:$0xff] %vm1826_vm8, %v1819_v35 }
 0x66d   :  { %v1821_v0 = vpop.permute.xlu0 %1820 }
 0x66e   :  { %1830 = vst.msk [vmem:[#allocation13 + $0x18] sm:$0xff] %vm1826_vm8, %v1821_v0 }
 0x66f   :  { %v1794_v55 = vpop.permute.xlu1 %1793 }
 0x670   :  { %1806 = vst.msk [vmem:[#allocation13] sm:$0xff] %vm1805_vm7, %v1794_v55 }
 0x671   :  { %v1796_v22 = vpop.permute.xlu0 %1795 }
 0x672   :  { %1807 = vst.msk [vmem:[#allocation13 + $0x8] sm:$0xff] %vm1805_vm7, %v1796_v22 }
 0x673   :  { %v1815_v37 = vpop.permute.xlu1 %1814 }
 0x674   :  { %1827 = vst.msk [vmem:[#allocation13] sm:$0xff] %vm1826_vm8, %v1815_v37 }
 0x675   :  { %v1817_v5 = vpop.permute.xlu0 %1816 }
 0x676   :  { %1828 = vst.msk [vmem:[#allocation13 + $0x8] sm:$0xff] %vm1826_vm8, %v1817_v5 }
 0x67c   :  { %v1836_v39 = vpop.permute.xlu1 %1835 }
 0x67d   :  { %1848 = vst.msk [vmem:[#allocation13] sm:$0xff] %vm1847_vm9, %v1836_v39 }
 0x67e   :  { %v1838_v18 = vpop.permute.xlu0 %1837 }
 0x67f   :  { %1849 = vst.msk [vmem:[#allocation13 + $0x8] sm:$0xff] %vm1847_vm9, %v1838_v18 }
 0x680   :  { %v1840_v56 = vpop.permute.xlu1 %1839 }
 0x681   :  { %1850 = vst.msk [vmem:[#allocation13 + $0x10] sm:$0xff] %vm1847_vm9, %v1840_v56 }
 0x682   :  { %v1842_v54 = vpop.permute.xlu0 %1841 }
 0x683   :  { %1851 = vst.msk [vmem:[#allocation13 + $0x18] sm:$0xff] %vm1847_vm9, %v1842_v54 }
 0x684   :  { %2436 = shalt.err (!%p2433_p10)
}
 0x685   :  { %s2437_s18 = scalar_lea.hbm %s3226_s6, 512 }
 0x686   :  { %p2438_p11 = scmp.ne.s32.totalorder %s3226_s6, %s2437_s18  ;;  %p2441_p12 = scmp.lt.u32.totalorder %s2437_s18, %s3226_s6 }
 0x688   :  { %p2443_p13 = pnand %p2441_p12, %p2438_p11 }
 0x68a   :  { %2446 = shalt.err (!%p2443_p13)
}
 0x68b   :  { %1863 = dma.vmem_to_hbm [thread:$0]  %s1858_s12, 512, %s3226_s6, [#allocation4], %s2458_s7, %s2458_s7, %s2459_s8  }
 0x68c   :  { %2455 = dma.done.wait [#allocation4], 512  }
 0x68d   :  { %2456 = vsyncadd [#allocation4], 4294966784 }
 0x68e   :  { %1867 = vsyncpa [#allocation3], 1 }
 0x68f   :  { %1868 = vsyncpa [#allocation6], 1 }
 0x690   :  { %1869 = vsyncpa [#allocation9], 1 }
 0x691   :  { %1870 = vsyncpa [#allocation12], 1 }
 0x692   :  { %1871 = vsyncpa [#allocation4], 1 }

</bundles_post_ra>
